<compile_context>
chip_gen: v7x
topology: tpu7x:2x2x1
jax: 0.10.0
libtpu: 0.0.40
codegen_flags: <defaults>
</compile_context>

<pallas_src>
import functools

import jax
import jax.numpy as jnp
from jax.experimental import pallas as pl
from jax.experimental.pallas import tpu as pltpu

NUM_CLS = 3
LANE = 128
TILE_B = 8  # batch rows per grid step (sublane-dense accumulator / stores)


def _averaging_kernel(ids_ref, table_ref, bp_ref, wh_ref, bh_ref, out_ref,
                      acc_ref, *, seq_len, num_classes, mask_seq):
    # ids_ref  : [TILE_B, TILE_S] int32   lane-dense token ids (padded)
    # table_ref: [V, H]   compute dtype   embedding table pre-folded with w_proj
    # bp_ref   : [1, H]   f32             proj bias
    # wh_ref   : [H, CPAD] compute dtype  head weight (class dim zero-padded)
    # bh_ref   : [1, CPAD] f32            head bias   (class dim zero-padded)
    # out_ref  : [TILE_B, CPAD] f32
    # acc_ref  : [TILE_B, H] f32 scratch  per-batch-row running sum over sequence
    s = pl.program_id(1)

    @pl.when(s == 0)
    def _init():
        acc_ref[...] = jnp.zeros_like(acc_ref)

    tile_b, tile_s = ids_ref.shape
    vocab = table_ref.shape[0]

    table = table_ref[...]          # load once (hoisted out of the row loop)
    bp = bp_ref[...]

    # --- fused embedding gather: one-hot(ids) @ table_proj on the MXU --------
    # Out-of-range ids map to an all-zero embedding row (reference would OOB).
    # TODO(synk): for large vocab, switch to scalar-prefetched SMEM ids + a
    # manual DMA row gather from an HBM-resident (memory_space=pl.ANY) table
    # instead of the one-hot-on-MXU gather.
    ids = ids_ref[...]                                            # [TB, TS]
    viota = jax.lax.broadcasted_iota(jnp.int32, (tile_b, tile_s, vocab), 2)
    onehot = (ids[:, :, None] == viota).astype(table.dtype)      # [TB, TS, V]

    if mask_seq:
        pos = jax.lax.broadcasted_iota(jnp.int32, (tile_s, 1), 0) + s * tile_s
        valid = pos < seq_len                                     # [TS, 1]

    # --- proj = ReLU(onehot @ table_proj + bp); accumulate per-row sums ------
    partial = []
    for bi in range(tile_b):        # static unroll: TILE_B clean 2-D MXU matmuls
        proj = jnp.dot(onehot[bi], table,
                       preferred_element_type=jnp.float32)        # [TS, H] f32
        proj = jnp.maximum(proj + bp, 0.0)                        # bias + ReLU
        if mask_seq:
            proj = jnp.where(valid, proj, 0.0)                    # drop padding
        partial.append(jnp.sum(proj, axis=0, keepdims=True))      # [1, H]
    acc_ref[...] += jnp.concatenate(partial, axis=0)              # [TB, H]

    # --- finalize: mean, head matmul, masked lane-dense softmax --------------
    @pl.when(s == pl.num_programs(1) - 1)
    def _finalize():
        avg = acc_ref[...] * (1.0 / seq_len)                      # true mean
        logits = jnp.dot(avg.astype(wh_ref.dtype), wh_ref[...],
                         preferred_element_type=jnp.float32) + bh_ref[...]
        lane = jax.lax.broadcasted_iota(jnp.int32, logits.shape, 1)
        mask = lane < num_classes
        masked = jnp.where(mask, logits, -1e30)
        m = jnp.max(masked, axis=-1, keepdims=True)
        e = jnp.where(mask, jnp.exp(masked - m), 0.0)
        denom = jnp.sum(e, axis=-1, keepdims=True)
        r = pl.reciprocal(denom, approx=True)
        r = r * (2.0 - denom * r)          # one Newton step -> ~f32 accuracy
        out_ref[...] = e * r                                      # [TB, CPAD]


def _pick_seq_tile(seq_len):
    # Whole sequence in one tile for small S; 256-granular tiles (good for the
    # 2x256^2 MXU on v6e/v7x, fine on v5e) once S is large. If S is not a tile
    # multiple the wrapper pads the sequence and the kernel masks the padding.
    if seq_len <= 512:
        return seq_len
    for t in (512, 256):
        if seq_len % t == 0:
            return t
    return 256


def _vmem_limit_bytes():
    # Generation-aware: ~75% of physical VMEM (≈48 MiB on v7x, ≈96 MiB on
    # v5e/v6e). Conservative 32 MiB fallback if the query API is unavailable.
    try:
        cap = pltpu.get_tpu_info().vmem_capacity_bytes
        return int(max(32 * 1024 * 1024, min(100 * 1024 * 1024, (cap * 3) // 4)))
    except Exception:
        return 32 * 1024 * 1024


def my_model_averaging_forward(x_ids, emb_table, w_proj, b_proj, w_head, b_head,
                               *, compute_dtype=jnp.bfloat16):
    """x_ids: [B, S] int32.  Returns softmax probs [B, NUM_CLS] float32."""
    B, S = x_ids.shape
    V, H = emb_table.shape
    C = w_head.shape[1]
    cpad = ((C + LANE - 1) // LANE) * LANE

    tile_b = TILE_B
    b_pad = ((B + tile_b - 1) // tile_b) * tile_b
    tile_s = _pick_seq_tile(S)
    s_pad = ((S + tile_s - 1) // tile_s) * tile_s
    n_b, n_s = b_pad // tile_b, s_pad // tile_s

    # Lane-dense padded ids (padded rows/positions use id 0; padded sequence
    # positions are masked inside the kernel, padded batch rows are sliced off).
    ids = jnp.zeros((b_pad, s_pad), jnp.int32).at[:B, :S].set(
        x_ids.astype(jnp.int32))

    # Fold w_proj into the embedding table once in the wrapper (exact:
    # emb = onehot @ table  =>  emb @ Wp = onehot @ (table @ Wp)).
    table_proj = jnp.dot(emb_table.astype(jnp.float32),
                         w_proj.astype(jnp.float32),
                         precision=jax.lax.Precision.HIGHEST).astype(compute_dtype)
    bp = b_proj.reshape(1, H).astype(jnp.float32)
    wh_pad = jnp.zeros((H, cpad), compute_dtype).at[:, :C].set(
        w_head.astype(compute_dtype))
    bh_pad = jnp.zeros((1, cpad), jnp.float32).at[:, :C].set(
        b_head.astype(jnp.float32))

    kernel = functools.partial(_averaging_kernel, seq_len=S, num_classes=C,
                               mask_seq=(s_pad != S))

    def run(single_buffer_consts):
        def const_spec(shape):
            if single_buffer_consts and hasattr(pl, "Buffered"):
                # Constant block index -> no need for double buffering in VMEM.
                return pl.BlockSpec(shape, lambda b, s: (0, 0),
                                    pipeline_mode=pl.Buffered(1))
            return pl.BlockSpec(shape, lambda b, s: (0, 0))

        grid_spec = pltpu.PrefetchScalarGridSpec(
            num_scalar_prefetch=0,
            grid=(n_b, n_s),
            in_specs=[
                pl.BlockSpec((tile_b, tile_s), lambda b, s: (b, s)),  # ids
                const_spec((V, H)),        # folded embedding table
                const_spec((1, H)),        # proj bias
                const_spec((H, cpad)),     # head weight (padded)
                const_spec((1, cpad)),     # head bias (padded)
            ],
            out_specs=pl.BlockSpec((tile_b, cpad), lambda b, s: (b, 0)),
            scratch_shapes=[pltpu.VMEM((tile_b, H), jnp.float32)],
        )
        return pl.pallas_call(
            kernel,
            out_shape=jax.ShapeDtypeStruct((b_pad, cpad), jnp.float32),
            grid_spec=grid_spec,
            compiler_params=pltpu.CompilerParams(
                dimension_semantics=("parallel", "arbitrary"),
                vmem_limit_bytes=_vmem_limit_bytes()),
        )(ids, table_proj, bp, wh_pad, bh_pad)

    try:
        out_padded = run(True)
    except Exception:
        # pipeline_mode / pl.Buffered(1) unsupported on this jax version:
        # fall back to default (double-buffered) specs.
        out_padded = run(False)

    return out_padded[:B, :C]


def _reference_forward(x_ids, emb_table, w_proj, b_proj, w_head, b_head):
    emb = emb_table[x_ids]                               # [B, S, H]
    proj = jnp.maximum(emb @ w_proj + b_proj, 0.0)       # [B, S, H]
    avg = jnp.mean(proj, axis=1)                         # [B, H]
    return jax.nn.softmax(avg @ w_head + b_head, axis=-1)


if __name__ == "__main__":
    # Small shapes consistent with the module: batch=2, seq=8, proj_size=32.
    B, S = 2, 8
    VOCAB = 32
    H = 32  # config['proj_size']

    key = jax.random.PRNGKey(0)
    k_ids, k_emb, k_wp, k_bp, k_wh, k_bh = jax.random.split(key, 6)

    x_ids = jax.random.randint(k_ids, (B, S), 0, VOCAB, dtype=jnp.int32)

    # Deterministic parameter init (synthetic, not a checkpoint load).
    emb_table = jax.random.normal(k_emb, (VOCAB, H), dtype=jnp.float32)
    w_proj = jax.random.normal(k_wp, (H, H), dtype=jnp.float32) * 0.1
    b_proj = jax.random.normal(k_bp, (H,), dtype=jnp.float32) * 0.1
    w_head = jax.random.normal(k_wh, (H, NUM_CLS), dtype=jnp.float32) * 0.1
    b_head = jax.random.normal(k_bh, (NUM_CLS,), dtype=jnp.float32) * 0.1

    ref = _reference_forward(x_ids, emb_table, w_proj, b_proj, w_head, b_head)

    # f32-operand path (strict check).
    out_f32 = my_model_averaging_forward(
        x_ids, emb_table, w_proj, b_proj, w_head, b_head,
        compute_dtype=jnp.float32)
    out_f32 = jax.block_until_ready(out_f32)
    assert out_f32.shape == (B, NUM_CLS)
    assert jnp.allclose(out_f32, ref, atol=2e-4, rtol=2e-4), (out_f32, ref)

    # bf16 MXU-operand path (default; full MXU rate on v5e/v6e/v7x,
    # f32 accumulation keeps numerics close).
    out_bf16 = my_model_averaging_forward(
        x_ids, emb_table, w_proj, b_proj, w_head, b_head,
        compute_dtype=jnp.bfloat16)
    out_bf16 = jax.block_until_ready(out_bf16)
    assert out_bf16.shape == (B, NUM_CLS)
    assert jnp.allclose(out_bf16, ref, atol=2e-2, rtol=2e-2), (out_bf16, ref)

    print("KERNEL_OK")
</pallas_src>

<mosaic_0001>
module attributes {stable_mosaic.version = 11 : i64} {
  func.func @_averaging_kernel(%arg0: i32, %arg1: i32, %arg2: memref<8x8xi32, #tpu.memory_space<vmem>>, %arg3: memref<32x32xf32, #tpu.memory_space<vmem>>, %arg4: memref<1x32xf32, #tpu.memory_space<vmem>>, %arg5: memref<32x128xf32, #tpu.memory_space<vmem>>, %arg6: memref<1x128xf32, #tpu.memory_space<vmem>>, %arg7: memref<8x128xf32, #tpu.memory_space<vmem>>, %arg8: memref<8x32xf32, #tpu.memory_space<vmem>>) attributes {dimension_semantics = [#tpu.dimension_semantics<parallel>, #tpu.dimension_semantics<arbitrary>], iteration_bounds = array<i64: 1, 1>, scalar_prefetch = 0 : i64, scratch_operands = 1 : i64, tpu.core_type = #tpu.core_type<tc>, window_params = [{transform_indices = @transform_0, window_bounds = array<i64: 8, 8>}, {pipeline_mode = #tpu.pipeline_mode<synchronous>, transform_indices = @transform_1, window_bounds = array<i64: 32, 32>}, {pipeline_mode = #tpu.pipeline_mode<synchronous>, transform_indices = @transform_2, window_bounds = array<i64: 1, 32>}, {pipeline_mode = #tpu.pipeline_mode<synchronous>, transform_indices = @transform_3, window_bounds = array<i64: 32, 128>}, {pipeline_mode = #tpu.pipeline_mode<synchronous>, transform_indices = @transform_4, window_bounds = array<i64: 1, 128>}, {transform_indices = @transform_5, window_bounds = array<i64: 8, 128>}]} {
    %c0_i32 = arith.constant 0 : i32
    %0 = arith.cmpi eq, %arg1, %c0_i32 : i32
    %1 = arith.extui %0 : i1 to i32
    %c0_i32_0 = arith.constant 0 : i32
    %2 = arith.cmpi ne, %1, %c0_i32_0 : i32
    scf.if %2 {
      %cst_35 = arith.constant 0.000000e+00 : f32
      %91 = vector.broadcast %cst_35 : f32 to vector<8x32xf32>
      %c0_36 = arith.constant 0 : index
      %c0_37 = arith.constant 0 : index
      %92 = vector.load %arg8[%c0_36, %c0_37] : memref<8x32xf32, #tpu.memory_space<vmem>>, vector<8x32xf32>
      tpu.vector_store %arg8[%c0_36, %c0_37], %91 {strides = array<i32>} : memref<8x32xf32, #tpu.memory_space<vmem>>, vector<8x32xf32>,
    } else {
    }
    %c0 = arith.constant 0 : index
    %c0_1 = arith.constant 0 : index
    %3 = vector.load %arg3[%c0, %c0_1] : memref<32x32xf32, #tpu.memory_space<vmem>>, vector<32x32xf32>
    %c0_2 = arith.constant 0 : index
    %c0_3 = arith.constant 0 : index
    %4 = vector.load %arg4[%c0_2, %c0_3] : memref<1x32xf32, #tpu.memory_space<vmem>>, vector<1x32xf32>
    %c0_4 = arith.constant 0 : index
    %c0_5 = arith.constant 0 : index
    %5 = vector.load %arg2[%c0_4, %c0_5] : memref<8x8xi32, #tpu.memory_space<vmem>>, vector<8x8xi32>
    %6 = tpu.iota {dimensions = array<i32: 2>} : vector<8x8x32xi32>
    %7 = vector.shape_cast %5 : vector<8x8xi32> to vector<8x8x1xi32>
    %8 = vector.broadcast %7 : vector<8x8x1xi32> to vector<8x8x32xi32>
    %9 = arith.cmpi eq, %8, %6 : vector<8x8x32xi32>
    %10 = arith.extui %9 : vector<8x8x32xi1> to vector<8x8x32xi32>
    %11 = arith.sitofp %10 : vector<8x8x32xi32> to vector<8x8x32xf32>
    %12 = vector.extract_strided_slice %11 {offsets = [0, 0, 0], sizes = [1, 8, 32], strides = [1, 1, 1]} : vector<8x8x32xf32> to vector<1x8x32xf32>
    %13 = vector.shape_cast %12 : vector<1x8x32xf32> to vector<8x32xf32>
    %cst = arith.constant dense<0.000000e+00> : vector<8x32xf32>
    %14 = tpu.matmul %13, %3, %cst {dimension_numbers = #tpu.dot_dimension_numbers<[1], [0], [0], [1], [0, 0, 1, 1], [], []>} : vector<8x32xf32>, vector<32x32xf32>, vector<8x32xf32> -> vector<8x32xf32>
    %15 = vector.broadcast %4 : vector<1x32xf32> to vector<8x32xf32>
    %16 = arith.addf %14, %15 : vector<8x32xf32>
    %cst_6 = arith.constant 0.000000e+00 : f32
    %17 = vector.broadcast %cst_6 : f32 to vector<8x32xf32>
    %18 = arith.maximumf %16, %17 : vector<8x32xf32>
    %cst_7 = arith.constant dense<0.000000e+00> : vector<32xf32>
    %19 = vector.multi_reduction <add>, %18, %cst_7 [0] : vector<8x32xf32> to vector<32xf32>
    %20 = vector.shape_cast %19 : vector<32xf32> to vector<1x32xf32>
    %21 = vector.extract_strided_slice %11 {offsets = [1, 0, 0], sizes = [1, 8, 32], strides = [1, 1, 1]} : vector<8x8x32xf32> to vector<1x8x32xf32>
    %22 = vector.shape_cast %21 : vector<1x8x32xf32> to vector<8x32xf32>
    %cst_8 = arith.constant dense<0.000000e+00> : vector<8x32xf32>
    %23 = tpu.matmul %22, %3, %cst_8 {dimension_numbers = #tpu.dot_dimension_numbers<[1], [0], [0], [1], [0, 0, 1, 1], [], []>} : vector<8x32xf32>, vector<32x32xf32>, vector<8x32xf32> -> vector<8x32xf32>
    %24 = vector.broadcast %4 : vector<1x32xf32> to vector<8x32xf32>
    %25 = arith.addf %23, %24 : vector<8x32xf32>
    %cst_9 = arith.constant 0.000000e+00 : f32
    %26 = vector.broadcast %cst_9 : f32 to vector<8x32xf32>
    %27 = arith.maximumf %25, %26 : vector<8x32xf32>
    %cst_10 = arith.constant dense<0.000000e+00> : vector<32xf32>
    %28 = vector.multi_reduction <add>, %27, %cst_10 [0] : vector<8x32xf32> to vector<32xf32>
    %29 = vector.shape_cast %28 : vector<32xf32> to vector<1x32xf32>
    %30 = vector.extract_strided_slice %11 {offsets = [2, 0, 0], sizes = [1, 8, 32], strides = [1, 1, 1]} : vector<8x8x32xf32> to vector<1x8x32xf32>
    %31 = vector.shape_cast %30 : vector<1x8x32xf32> to vector<8x32xf32>
    %cst_11 = arith.constant dense<0.000000e+00> : vector<8x32xf32>
    %32 = tpu.matmul %31, %3, %cst_11 {dimension_numbers = #tpu.dot_dimension_numbers<[1], [0], [0], [1], [0, 0, 1, 1], [], []>} : vector<8x32xf32>, vector<32x32xf32>, vector<8x32xf32> -> vector<8x32xf32>
    %33 = vector.broadcast %4 : vector<1x32xf32> to vector<8x32xf32>
    %34 = arith.addf %32, %33 : vector<8x32xf32>
    %cst_12 = arith.constant 0.000000e+00 : f32
    %35 = vector.broadcast %cst_12 : f32 to vector<8x32xf32>
    %36 = arith.maximumf %34, %35 : vector<8x32xf32>
    %cst_13 = arith.constant dense<0.000000e+00> : vector<32xf32>
    %37 = vector.multi_reduction <add>, %36, %cst_13 [0] : vector<8x32xf32> to vector<32xf32>
    %38 = vector.shape_cast %37 : vector<32xf32> to vector<1x32xf32>
    %39 = vector.extract_strided_slice %11 {offsets = [3, 0, 0], sizes = [1, 8, 32], strides = [1, 1, 1]} : vector<8x8x32xf32> to vector<1x8x32xf32>
    %40 = vector.shape_cast %39 : vector<1x8x32xf32> to vector<8x32xf32>
    %cst_14 = arith.constant dense<0.000000e+00> : vector<8x32xf32>
    %41 = tpu.matmul %40, %3, %cst_14 {dimension_numbers = #tpu.dot_dimension_numbers<[1], [0], [0], [1], [0, 0, 1, 1], [], []>} : vector<8x32xf32>, vector<32x32xf32>, vector<8x32xf32> -> vector<8x32xf32>
    %42 = vector.broadcast %4 : vector<1x32xf32> to vector<8x32xf32>
    %43 = arith.addf %41, %42 : vector<8x32xf32>
    %cst_15 = arith.constant 0.000000e+00 : f32
    %44 = vector.broadcast %cst_15 : f32 to vector<8x32xf32>
    %45 = arith.maximumf %43, %44 : vector<8x32xf32>
    %cst_16 = arith.constant dense<0.000000e+00> : vector<32xf32>
    %46 = vector.multi_reduction <add>, %45, %cst_16 [0] : vector<8x32xf32> to vector<32xf32>
    %47 = vector.shape_cast %46 : vector<32xf32> to vector<1x32xf32>
    %48 = vector.extract_strided_slice %11 {offsets = [4, 0, 0], sizes = [1, 8, 32], strides = [1, 1, 1]} : vector<8x8x32xf32> to vector<1x8x32xf32>
    %49 = vector.shape_cast %48 : vector<1x8x32xf32> to vector<8x32xf32>
    %cst_17 = arith.constant dense<0.000000e+00> : vector<8x32xf32>
    %50 = tpu.matmul %49, %3, %cst_17 {dimension_numbers = #tpu.dot_dimension_numbers<[1], [0], [0], [1], [0, 0, 1, 1], [], []>} : vector<8x32xf32>, vector<32x32xf32>, vector<8x32xf32> -> vector<8x32xf32>
    %51 = vector.broadcast %4 : vector<1x32xf32> to vector<8x32xf32>
    %52 = arith.addf %50, %51 : vector<8x32xf32>
    %cst_18 = arith.constant 0.000000e+00 : f32
    %53 = vector.broadcast %cst_18 : f32 to vector<8x32xf32>
    %54 = arith.maximumf %52, %53 : vector<8x32xf32>
    %cst_19 = arith.constant dense<0.000000e+00> : vector<32xf32>
    %55 = vector.multi_reduction <add>, %54, %cst_19 [0] : vector<8x32xf32> to vector<32xf32>
    %56 = vector.shape_cast %55 : vector<32xf32> to vector<1x32xf32>
    %57 = vector.extract_strided_slice %11 {offsets = [5, 0, 0], sizes = [1, 8, 32], strides = [1, 1, 1]} : vector<8x8x32xf32> to vector<1x8x32xf32>
    %58 = vector.shape_cast %57 : vector<1x8x32xf32> to vector<8x32xf32>
    %cst_20 = arith.constant dense<0.000000e+00> : vector<8x32xf32>
    %59 = tpu.matmul %58, %3, %cst_20 {dimension_numbers = #tpu.dot_dimension_numbers<[1], [0], [0], [1], [0, 0, 1, 1], [], []>} : vector<8x32xf32>, vector<32x32xf32>, vector<8x32xf32> -> vector<8x32xf32>
    %60 = vector.broadcast %4 : vector<1x32xf32> to vector<8x32xf32>
    %61 = arith.addf %59, %60 : vector<8x32xf32>
    %cst_21 = arith.constant 0.000000e+00 : f32
    %62 = vector.broadcast %cst_21 : f32 to vector<8x32xf32>
    %63 = arith.maximumf %61, %62 : vector<8x32xf32>
    %cst_22 = arith.constant dense<0.000000e+00> : vector<32xf32>
    %64 = vector.multi_reduction <add>, %63, %cst_22 [0] : vector<8x32xf32> to vector<32xf32>
    %65 = vector.shape_cast %64 : vector<32xf32> to vector<1x32xf32>
    %66 = vector.extract_strided_slice %11 {offsets = [6, 0, 0], sizes = [1, 8, 32], strides = [1, 1, 1]} : vector<8x8x32xf32> to vector<1x8x32xf32>
    %67 = vector.shape_cast %66 : vector<1x8x32xf32> to vector<8x32xf32>
    %cst_23 = arith.constant dense<0.000000e+00> : vector<8x32xf32>
    %68 = tpu.matmul %67, %3, %cst_23 {dimension_numbers = #tpu.dot_dimension_numbers<[1], [0], [0], [1], [0, 0, 1, 1], [], []>} : vector<8x32xf32>, vector<32x32xf32>, vector<8x32xf32> -> vector<8x32xf32>
    %69 = vector.broadcast %4 : vector<1x32xf32> to vector<8x32xf32>
    %70 = arith.addf %68, %69 : vector<8x32xf32>
    %cst_24 = arith.constant 0.000000e+00 : f32
    %71 = vector.broadcast %cst_24 : f32 to vector<8x32xf32>
    %72 = arith.maximumf %70, %71 : vector<8x32xf32>
    %cst_25 = arith.constant dense<0.000000e+00> : vector<32xf32>
    %73 = vector.multi_reduction <add>, %72, %cst_25 [0] : vector<8x32xf32> to vector<32xf32>
    %74 = vector.shape_cast %73 : vector<32xf32> to vector<1x32xf32>
    %75 = vector.extract_strided_slice %11 {offsets = [7, 0, 0], sizes = [1, 8, 32], strides = [1, 1, 1]} : vector<8x8x32xf32> to vector<1x8x32xf32>
    %76 = vector.shape_cast %75 : vector<1x8x32xf32> to vector<8x32xf32>
    %cst_26 = arith.constant dense<0.000000e+00> : vector<8x32xf32>
    %77 = tpu.matmul %76, %3, %cst_26 {dimension_numbers = #tpu.dot_dimension_numbers<[1], [0], [0], [1], [0, 0, 1, 1], [], []>} : vector<8x32xf32>, vector<32x32xf32>, vector<8x32xf32> -> vector<8x32xf32>
    %78 = vector.broadcast %4 : vector<1x32xf32> to vector<8x32xf32>
    %79 = arith.addf %77, %78 : vector<8x32xf32>
    %cst_27 = arith.constant 0.000000e+00 : f32
    %80 = vector.broadcast %cst_27 : f32 to vector<8x32xf32>
    %81 = arith.maximumf %79, %80 : vector<8x32xf32>
    %cst_28 = arith.constant dense<0.000000e+00> : vector<32xf32>
    %82 = vector.multi_reduction <add>, %81, %cst_28 [0] : vector<8x32xf32> to vector<32xf32>
    %83 = vector.shape_cast %82 : vector<32xf32> to vector<1x32xf32>
    %c0_29 = arith.constant 0 : index
    %c0_30 = arith.constant 0 : index
    %84 = vector.load %arg8[%c0_29, %c0_30] : memref<8x32xf32, #tpu.memory_space<vmem>>, vector<8x32xf32>
    %85 = tpu.concatenate %20, %29, %38, %47, %56, %65, %74, %83 in 0 : vector<1x32xf32>, vector<1x32xf32>, vector<1x32xf32>, vector<1x32xf32>, vector<1x32xf32>, vector<1x32xf32>, vector<1x32xf32>, vector<1x32xf32> -> vector<8x32xf32>
    %86 = arith.addf %84, %85 : vector<8x32xf32>
    %c0_31 = arith.constant 0 : index
    %c0_32 = arith.constant 0 : index
    %87 = vector.load %arg8[%c0_31, %c0_32] : memref<8x32xf32, #tpu.memory_space<vmem>>, vector<8x32xf32>
    tpu.vector_store %arg8[%c0_31, %c0_32], %86 {strides = array<i32>} : memref<8x32xf32, #tpu.memory_space<vmem>>, vector<8x32xf32>,
    %c0_i32_33 = arith.constant 0 : i32
    %88 = arith.cmpi eq, %arg1, %c0_i32_33 : i32
    %89 = arith.extui %88 : i1 to i32
    %c0_i32_34 = arith.constant 0 : i32
    %90 = arith.cmpi ne, %89, %c0_i32_34 : i32
    scf.if %90 {
      %c0_35 = arith.constant 0 : index
      %c0_36 = arith.constant 0 : index
      %91 = vector.load %arg8[%c0_35, %c0_36] : memref<8x32xf32, #tpu.memory_space<vmem>>, vector<8x32xf32>
      %cst_37 = arith.constant 1.250000e-01 : f32
      %92 = vector.broadcast %cst_37 : f32 to vector<8x32xf32>
      %93 = arith.mulf %91, %92 : vector<8x32xf32>
      %c0_38 = arith.constant 0 : index
      %c0_39 = arith.constant 0 : index
      %94 = vector.load %arg5[%c0_38, %c0_39] : memref<32x128xf32, #tpu.memory_space<vmem>>, vector<32x128xf32>
      %cst_40 = arith.constant dense<0.000000e+00> : vector<8x128xf32>
      %95 = tpu.matmul %93, %94, %cst_40 {dimension_numbers = #tpu.dot_dimension_numbers<[1], [0], [0], [1], [0, 0, 1, 1], [], []>} : vector<8x32xf32>, vector<32x128xf32>, vector<8x128xf32> -> vector<8x128xf32>
      %c0_41 = arith.constant 0 : index
      %c0_42 = arith.constant 0 : index
      %96 = vector.load %arg6[%c0_41, %c0_42] : memref<1x128xf32, #tpu.memory_space<vmem>>, vector<1x128xf32>
      %97 = vector.broadcast %96 : vector<1x128xf32> to vector<8x128xf32>
      %98 = arith.addf %95, %97 : vector<8x128xf32>
      %99 = tpu.iota {dimensions = array<i32: 1>} : vector<8x128xi32>
      %c3_i32 = arith.constant 3 : i32
      %100 = vector.broadcast %c3_i32 : i32 to vector<8x128xi32>
      %101 = arith.cmpi slt, %99, %100 : vector<8x128xi32>
      %cst_43 = arith.constant -1.000000e+30 : f32
      %102 = vector.broadcast %cst_43 : f32 to vector<8x128xf32>
      %103 = arith.select %101, %98, %102 : vector<8x128xi1>, vector<8x128xf32>
      %cst_44 = arith.constant dense<0xFF800000> : vector<8xf32>
      %104 = vector.multi_reduction <maximumf>, %103, %cst_44 [1] : vector<8x128xf32> to vector<8xf32>
      %105 = vector.shape_cast %104 : vector<8xf32> to vector<8x1xf32>
      %106 = vector.broadcast %105 : vector<8x1xf32> to vector<8x128xf32>
      %107 = arith.subf %103, %106 : vector<8x128xf32>
      %108 = math.exp %107 : vector<8x128xf32>
      %cst_45 = arith.constant 0.000000e+00 : f32
      %109 = vector.broadcast %cst_45 : f32 to vector<8x128xf32>
      %110 = arith.select %101, %108, %109 : vector<8x128xi1>, vector<8x128xf32>
      %cst_46 = arith.constant dense<0.000000e+00> : vector<8xf32>
      %111 = vector.multi_reduction <add>, %110, %cst_46 [1] : vector<8x128xf32> to vector<8xf32>
      %112 = vector.shape_cast %111 : vector<8xf32> to vector<8x1xf32>
      %113 = tpu.reciprocal %112 {approx = true} : vector<8x1xf32> -> vector<8x1xf32>
      %114 = arith.mulf %112, %113 : vector<8x1xf32>
      %cst_47 = arith.constant 2.000000e+00 : f32
      %115 = vector.broadcast %cst_47 : f32 to vector<8x1xf32>
      %116 = arith.subf %115, %114 : vector<8x1xf32>
      %117 = arith.mulf %113, %116 : vector<8x1xf32>
      %118 = vector.broadcast %117 : vector<8x1xf32> to vector<8x128xf32>
      %119 = arith.mulf %110, %118 : vector<8x128xf32>
      %c0_48 = arith.constant 0 : index
      %c0_49 = arith.constant 0 : index
      %120 = vector.load %arg7[%c0_48, %c0_49] : memref<8x128xf32, #tpu.memory_space<vmem>>, vector<8x128xf32>
      tpu.vector_store %arg7[%c0_48, %c0_49], %119 {strides = array<i32>} : memref<8x128xf32, #tpu.memory_space<vmem>>, vector<8x128xf32>,
    } else {
    }
    return
  }
  func.func @transform_0(%arg0: i32, %arg1: i32) -> (i32, i32) {
    %c0_i32 = arith.constant 0 : i32
    return %arg0, %arg1 : i32, i32
  }
  func.func @transform_1(%arg0: i32, %arg1: i32) -> (i32, i32) {
    %c0_i32 = arith.constant 0 : i32
    %c0_i32_0 = arith.constant 0 : i32
    %c0_i32_1 = arith.constant 0 : i32
    return %c0_i32, %c0_i32_0 : i32, i32
  }
  func.func @transform_2(%arg0: i32, %arg1: i32) -> (i32, i32) {
    %c0_i32 = arith.constant 0 : i32
    %c0_i32_0 = arith.constant 0 : i32
    %c0_i32_1 = arith.constant 0 : i32
    return %c0_i32, %c0_i32_0 : i32, i32
  }
  func.func @transform_3(%arg0: i32, %arg1: i32) -> (i32, i32) {
    %c0_i32 = arith.constant 0 : i32
    %c0_i32_0 = arith.constant 0 : i32
    %c0_i32_1 = arith.constant 0 : i32
    return %c0_i32, %c0_i32_0 : i32, i32
  }
  func.func @transform_4(%arg0: i32, %arg1: i32) -> (i32, i32) {
    %c0_i32 = arith.constant 0 : i32
    %c0_i32_0 = arith.constant 0 : i32
    %c0_i32_1 = arith.constant 0 : i32
    return %c0_i32, %c0_i32_0 : i32, i32
  }
  func.func @transform_5(%arg0: i32, %arg1: i32) -> (i32, i32) {
    %c0_i32 = arith.constant 0 : i32
    %c0_i32_0 = arith.constant 0 : i32
    return %arg0, %c0_i32 : i32, i32
  }
}

module attributes {stable_mosaic.version = 11 : i64} {
  func.func @_averaging_kernel(%arg0: i32, %arg1: i32, %arg2: memref<8x8xi32, #tpu.memory_space<vmem>>, %arg3: memref<32x32xf32, #tpu.memory_space<vmem>>, %arg4: memref<1x32xf32, #tpu.memory_space<vmem>>, %arg5: memref<32x128xf32, #tpu.memory_space<vmem>>, %arg6: memref<1x128xf32, #tpu.memory_space<vmem>>, %arg7: memref<8x128xf32, #tpu.memory_space<vmem>>, %arg8: memref<8x32xf32, #tpu.memory_space<vmem>>) attributes {dimension_semantics = [#tpu.dimension_semantics<parallel>, #tpu.dimension_semantics<arbitrary>], iteration_bounds = array<i64: 1, 1>, scalar_prefetch = 0 : i64, scratch_operands = 1 : i64, tpu.core_type = #tpu.core_type<tc>, window_params = [{transform_indices = @transform_0, window_bounds = array<i64: 8, 8>}, {pipeline_mode = #tpu.pipeline_mode<synchronous>, transform_indices = @transform_1, window_bounds = array<i64: 32, 32>}, {pipeline_mode = #tpu.pipeline_mode<synchronous>, transform_indices = @transform_2, window_bounds = array<i64: 1, 32>}, {pipeline_mode = #tpu.pipeline_mode<synchronous>, transform_indices = @transform_3, window_bounds = array<i64: 32, 128>}, {pipeline_mode = #tpu.pipeline_mode<synchronous>, transform_indices = @transform_4, window_bounds = array<i64: 1, 128>}, {transform_indices = @transform_5, window_bounds = array<i64: 8, 128>}]} {
    %c0_i32 = arith.constant 0 : i32
    %0 = arith.cmpi eq, %arg1, %c0_i32 : i32
    %1 = arith.extui %0 : i1 to i32
    %c0_i32_0 = arith.constant 0 : i32
    %2 = arith.cmpi ne, %1, %c0_i32_0 : i32
    scf.if %2 {
      %cst_35 = arith.constant 0.000000e+00 : f32
      %91 = vector.broadcast %cst_35 : f32 to vector<8x32xf32>
      %c0_36 = arith.constant 0 : index
      %c0_37 = arith.constant 0 : index
      %92 = vector.load %arg8[%c0_36, %c0_37] : memref<8x32xf32, #tpu.memory_space<vmem>>, vector<8x32xf32>
      tpu.vector_store %arg8[%c0_36, %c0_37], %91 {strides = array<i32>} : memref<8x32xf32, #tpu.memory_space<vmem>>, vector<8x32xf32>,
    } else {
    }
    %c0 = arith.constant 0 : index
    %c0_1 = arith.constant 0 : index
    %3 = vector.load %arg3[%c0, %c0_1] : memref<32x32xf32, #tpu.memory_space<vmem>>, vector<32x32xf32>
    %c0_2 = arith.constant 0 : index
    %c0_3 = arith.constant 0 : index
    %4 = vector.load %arg4[%c0_2, %c0_3] : memref<1x32xf32, #tpu.memory_space<vmem>>, vector<1x32xf32>
    %c0_4 = arith.constant 0 : index
    %c0_5 = arith.constant 0 : index
    %5 = vector.load %arg2[%c0_4, %c0_5] : memref<8x8xi32, #tpu.memory_space<vmem>>, vector<8x8xi32>
    %6 = tpu.iota {dimensions = array<i32: 2>} : vector<8x8x32xi32>
    %7 = vector.shape_cast %5 : vector<8x8xi32> to vector<8x8x1xi32>
    %8 = vector.broadcast %7 : vector<8x8x1xi32> to vector<8x8x32xi32>
    %9 = arith.cmpi eq, %8, %6 : vector<8x8x32xi32>
    %10 = arith.extui %9 : vector<8x8x32xi1> to vector<8x8x32xi32>
    %11 = arith.sitofp %10 : vector<8x8x32xi32> to vector<8x8x32xf32>
    %12 = vector.extract_strided_slice %11 {offsets = [0, 0, 0], sizes = [1, 8, 32], strides = [1, 1, 1]} : vector<8x8x32xf32> to vector<1x8x32xf32>
    %13 = vector.shape_cast %12 : vector<1x8x32xf32> to vector<8x32xf32>
    %cst = arith.constant dense<0.000000e+00> : vector<8x32xf32>
    %14 = tpu.matmul %13, %3, %cst {dimension_numbers = #tpu.dot_dimension_numbers<[1], [0], [0], [1], [0, 0, 1, 1], [], []>} : vector<8x32xf32>, vector<32x32xf32>, vector<8x32xf32> -> vector<8x32xf32>
    %15 = vector.broadcast %4 : vector<1x32xf32> to vector<8x32xf32>
    %16 = arith.addf %14, %15 : vector<8x32xf32>
    %cst_6 = arith.constant 0.000000e+00 : f32
    %17 = vector.broadcast %cst_6 : f32 to vector<8x32xf32>
    %18 = arith.maximumf %16, %17 : vector<8x32xf32>
    %cst_7 = arith.constant dense<0.000000e+00> : vector<32xf32>
    %19 = vector.multi_reduction <add>, %18, %cst_7 [0] : vector<8x32xf32> to vector<32xf32>
    %20 = vector.shape_cast %19 : vector<32xf32> to vector<1x32xf32>
    %21 = vector.extract_strided_slice %11 {offsets = [1, 0, 0], sizes = [1, 8, 32], strides = [1, 1, 1]} : vector<8x8x32xf32> to vector<1x8x32xf32>
    %22 = vector.shape_cast %21 : vector<1x8x32xf32> to vector<8x32xf32>
    %cst_8 = arith.constant dense<0.000000e+00> : vector<8x32xf32>
    %23 = tpu.matmul %22, %3, %cst_8 {dimension_numbers = #tpu.dot_dimension_numbers<[1], [0], [0], [1], [0, 0, 1, 1], [], []>} : vector<8x32xf32>, vector<32x32xf32>, vector<8x32xf32> -> vector<8x32xf32>
    %24 = vector.broadcast %4 : vector<1x32xf32> to vector<8x32xf32>
    %25 = arith.addf %23, %24 : vector<8x32xf32>
    %cst_9 = arith.constant 0.000000e+00 : f32
    %26 = vector.broadcast %cst_9 : f32 to vector<8x32xf32>
    %27 = arith.maximumf %25, %26 : vector<8x32xf32>
    %cst_10 = arith.constant dense<0.000000e+00> : vector<32xf32>
    %28 = vector.multi_reduction <add>, %27, %cst_10 [0] : vector<8x32xf32> to vector<32xf32>
    %29 = vector.shape_cast %28 : vector<32xf32> to vector<1x32xf32>
    %30 = vector.extract_strided_slice %11 {offsets = [2, 0, 0], sizes = [1, 8, 32], strides = [1, 1, 1]} : vector<8x8x32xf32> to vector<1x8x32xf32>
    %31 = vector.shape_cast %30 : vector<1x8x32xf32> to vector<8x32xf32>
    %cst_11 = arith.constant dense<0.000000e+00> : vector<8x32xf32>
    %32 = tpu.matmul %31, %3, %cst_11 {dimension_numbers = #tpu.dot_dimension_numbers<[1], [0], [0], [1], [0, 0, 1, 1], [], []>} : vector<8x32xf32>, vector<32x32xf32>, vector<8x32xf32> -> vector<8x32xf32>
    %33 = vector.broadcast %4 : vector<1x32xf32> to vector<8x32xf32>
    %34 = arith.addf %32, %33 : vector<8x32xf32>
    %cst_12 = arith.constant 0.000000e+00 : f32
    %35 = vector.broadcast %cst_12 : f32 to vector<8x32xf32>
    %36 = arith.maximumf %34, %35 : vector<8x32xf32>
    %cst_13 = arith.constant dense<0.000000e+00> : vector<32xf32>
    %37 = vector.multi_reduction <add>, %36, %cst_13 [0] : vector<8x32xf32> to vector<32xf32>
    %38 = vector.shape_cast %37 : vector<32xf32> to vector<1x32xf32>
    %39 = vector.extract_strided_slice %11 {offsets = [3, 0, 0], sizes = [1, 8, 32], strides = [1, 1, 1]} : vector<8x8x32xf32> to vector<1x8x32xf32>
    %40 = vector.shape_cast %39 : vector<1x8x32xf32> to vector<8x32xf32>
    %cst_14 = arith.constant dense<0.000000e+00> : vector<8x32xf32>
    %41 = tpu.matmul %40, %3, %cst_14 {dimension_numbers = #tpu.dot_dimension_numbers<[1], [0], [0], [1], [0, 0, 1, 1], [], []>} : vector<8x32xf32>, vector<32x32xf32>, vector<8x32xf32> -> vector<8x32xf32>
    %42 = vector.broadcast %4 : vector<1x32xf32> to vector<8x32xf32>
    %43 = arith.addf %41, %42 : vector<8x32xf32>
    %cst_15 = arith.constant 0.000000e+00 : f32
    %44 = vector.broadcast %cst_15 : f32 to vector<8x32xf32>
    %45 = arith.maximumf %43, %44 : vector<8x32xf32>
    %cst_16 = arith.constant dense<0.000000e+00> : vector<32xf32>
    %46 = vector.multi_reduction <add>, %45, %cst_16 [0] : vector<8x32xf32> to vector<32xf32>
    %47 = vector.shape_cast %46 : vector<32xf32> to vector<1x32xf32>
    %48 = vector.extract_strided_slice %11 {offsets = [4, 0, 0], sizes = [1, 8, 32], strides = [1, 1, 1]} : vector<8x8x32xf32> to vector<1x8x32xf32>
    %49 = vector.shape_cast %48 : vector<1x8x32xf32> to vector<8x32xf32>
    %cst_17 = arith.constant dense<0.000000e+00> : vector<8x32xf32>
    %50 = tpu.matmul %49, %3, %cst_17 {dimension_numbers = #tpu.dot_dimension_numbers<[1], [0], [0], [1], [0, 0, 1, 1], [], []>} : vector<8x32xf32>, vector<32x32xf32>, vector<8x32xf32> -> vector<8x32xf32>
    %51 = vector.broadcast %4 : vector<1x32xf32> to vector<8x32xf32>
    %52 = arith.addf %50, %51 : vector<8x32xf32>
    %cst_18 = arith.constant 0.000000e+00 : f32
    %53 = vector.broadcast %cst_18 : f32 to vector<8x32xf32>
    %54 = arith.maximumf %52, %53 : vector<8x32xf32>
    %cst_19 = arith.constant dense<0.000000e+00> : vector<32xf32>
    %55 = vector.multi_reduction <add>, %54, %cst_19 [0] : vector<8x32xf32> to vector<32xf32>
    %56 = vector.shape_cast %55 : vector<32xf32> to vector<1x32xf32>
    %57 = vector.extract_strided_slice %11 {offsets = [5, 0, 0], sizes = [1, 8, 32], strides = [1, 1, 1]} : vector<8x8x32xf32> to vector<1x8x32xf32>
    %58 = vector.shape_cast %57 : vector<1x8x32xf32> to vector<8x32xf32>
    %cst_20 = arith.constant dense<0.000000e+00> : vector<8x32xf32>
    %59 = tpu.matmul %58, %3, %cst_20 {dimension_numbers = #tpu.dot_dimension_numbers<[1], [0], [0], [1], [0, 0, 1, 1], [], []>} : vector<8x32xf32>, vector<32x32xf32>, vector<8x32xf32> -> vector<8x32xf32>
    %60 = vector.broadcast %4 : vector<1x32xf32> to vector<8x32xf32>
    %61 = arith.addf %59, %60 : vector<8x32xf32>
    %cst_21 = arith.constant 0.000000e+00 : f32
    %62 = vector.broadcast %cst_21 : f32 to vector<8x32xf32>
    %63 = arith.maximumf %61, %62 : vector<8x32xf32>
    %cst_22 = arith.constant dense<0.000000e+00> : vector<32xf32>
    %64 = vector.multi_reduction <add>, %63, %cst_22 [0] : vector<8x32xf32> to vector<32xf32>
    %65 = vector.shape_cast %64 : vector<32xf32> to vector<1x32xf32>
    %66 = vector.extract_strided_slice %11 {offsets = [6, 0, 0], sizes = [1, 8, 32], strides = [1, 1, 1]} : vector<8x8x32xf32> to vector<1x8x32xf32>
    %67 = vector.shape_cast %66 : vector<1x8x32xf32> to vector<8x32xf32>
    %cst_23 = arith.constant dense<0.000000e+00> : vector<8x32xf32>
    %68 = tpu.matmul %67, %3, %cst_23 {dimension_numbers = #tpu.dot_dimension_numbers<[1], [0], [0], [1], [0, 0, 1, 1], [], []>} : vector<8x32xf32>, vector<32x32xf32>, vector<8x32xf32> -> vector<8x32xf32>
    %69 = vector.broadcast %4 : vector<1x32xf32> to vector<8x32xf32>
    %70 = arith.addf %68, %69 : vector<8x32xf32>
    %cst_24 = arith.constant 0.000000e+00 : f32
    %71 = vector.broadcast %cst_24 : f32 to vector<8x32xf32>
    %72 = arith.maximumf %70, %71 : vector<8x32xf32>
    %cst_25 = arith.constant dense<0.000000e+00> : vector<32xf32>
    %73 = vector.multi_reduction <add>, %72, %cst_25 [0] : vector<8x32xf32> to vector<32xf32>
    %74 = vector.shape_cast %73 : vector<32xf32> to vector<1x32xf32>
    %75 = vector.extract_strided_slice %11 {offsets = [7, 0, 0], sizes = [1, 8, 32], strides = [1, 1, 1]} : vector<8x8x32xf32> to vector<1x8x32xf32>
    %76 = vector.shape_cast %75 : vector<1x8x32xf32> to vector<8x32xf32>
    %cst_26 = arith.constant dense<0.000000e+00> : vector<8x32xf32>
    %77 = tpu.matmul %76, %3, %cst_26 {dimension_numbers = #tpu.dot_dimension_numbers<[1], [0], [0], [1], [0, 0, 1, 1], [], []>} : vector<8x32xf32>, vector<32x32xf32>, vector<8x32xf32> -> vector<8x32xf32>
    %78 = vector.broadcast %4 : vector<1x32xf32> to vector<8x32xf32>
    %79 = arith.addf %77, %78 : vector<8x32xf32>
    %cst_27 = arith.constant 0.000000e+00 : f32
    %80 = vector.broadcast %cst_27 : f32 to vector<8x32xf32>
    %81 = arith.maximumf %79, %80 : vector<8x32xf32>
    %cst_28 = arith.constant dense<0.000000e+00> : vector<32xf32>
    %82 = vector.multi_reduction <add>, %81, %cst_28 [0] : vector<8x32xf32> to vector<32xf32>
    %83 = vector.shape_cast %82 : vector<32xf32> to vector<1x32xf32>
    %c0_29 = arith.constant 0 : index
    %c0_30 = arith.constant 0 : index
    %84 = vector.load %arg8[%c0_29, %c0_30] : memref<8x32xf32, #tpu.memory_space<vmem>>, vector<8x32xf32>
    %85 = tpu.concatenate %20, %29, %38, %47, %56, %65, %74, %83 in 0 : vector<1x32xf32>, vector<1x32xf32>, vector<1x32xf32>, vector<1x32xf32>, vector<1x32xf32>, vector<1x32xf32>, vector<1x32xf32>, vector<1x32xf32> -> vector<8x32xf32>
    %86 = arith.addf %84, %85 : vector<8x32xf32>
    %c0_31 = arith.constant 0 : index
    %c0_32 = arith.constant 0 : index
    %87 = vector.load %arg8[%c0_31, %c0_32] : memref<8x32xf32, #tpu.memory_space<vmem>>, vector<8x32xf32>
    tpu.vector_store %arg8[%c0_31, %c0_32], %86 {strides = array<i32>} : memref<8x32xf32, #tpu.memory_space<vmem>>, vector<8x32xf32>,
    %c0_i32_33 = arith.constant 0 : i32
    %88 = arith.cmpi eq, %arg1, %c0_i32_33 : i32
    %89 = arith.extui %88 : i1 to i32
    %c0_i32_34 = arith.constant 0 : i32
    %90 = arith.cmpi ne, %89, %c0_i32_34 : i32
    scf.if %90 {
      %c0_35 = arith.constant 0 : index
      %c0_36 = arith.constant 0 : index
      %91 = vector.load %arg8[%c0_35, %c0_36] : memref<8x32xf32, #tpu.memory_space<vmem>>, vector<8x32xf32>
      %cst_37 = arith.constant 1.250000e-01 : f32
      %92 = vector.broadcast %cst_37 : f32 to vector<8x32xf32>
      %93 = arith.mulf %91, %92 : vector<8x32xf32>
      %c0_38 = arith.constant 0 : index
      %c0_39 = arith.constant 0 : index
      %94 = vector.load %arg5[%c0_38, %c0_39] : memref<32x128xf32, #tpu.memory_space<vmem>>, vector<32x128xf32>
      %cst_40 = arith.constant dense<0.000000e+00> : vector<8x128xf32>
      %95 = tpu.matmul %93, %94, %cst_40 {dimension_numbers = #tpu.dot_dimension_numbers<[1], [0], [0], [1], [0, 0, 1, 1], [], []>} : vector<8x32xf32>, vector<32x128xf32>, vector<8x128xf32> -> vector<8x128xf32>
      %c0_41 = arith.constant 0 : index
      %c0_42 = arith.constant 0 : index
      %96 = vector.load %arg6[%c0_41, %c0_42] : memref<1x128xf32, #tpu.memory_space<vmem>>, vector<1x128xf32>
      %97 = vector.broadcast %96 : vector<1x128xf32> to vector<8x128xf32>
      %98 = arith.addf %95, %97 : vector<8x128xf32>
      %99 = tpu.iota {dimensions = array<i32: 1>} : vector<8x128xi32>
      %c3_i32 = arith.constant 3 : i32
      %100 = vector.broadcast %c3_i32 : i32 to vector<8x128xi32>
      %101 = arith.cmpi slt, %99, %100 : vector<8x128xi32>
      %cst_43 = arith.constant -1.000000e+30 : f32
      %102 = vector.broadcast %cst_43 : f32 to vector<8x128xf32>
      %103 = arith.select %101, %98, %102 : vector<8x128xi1>, vector<8x128xf32>
      %cst_44 = arith.constant dense<0xFF800000> : vector<8xf32>
      %104 = vector.multi_reduction <maximumf>, %103, %cst_44 [1] : vector<8x128xf32> to vector<8xf32>
      %105 = vector.shape_cast %104 : vector<8xf32> to vector<8x1xf32>
      %106 = vector.broadcast %105 : vector<8x1xf32> to vector<8x128xf32>
      %107 = arith.subf %103, %106 : vector<8x128xf32>
      %108 = math.exp %107 : vector<8x128xf32>
      %cst_45 = arith.constant 0.000000e+00 : f32
      %109 = vector.broadcast %cst_45 : f32 to vector<8x128xf32>
      %110 = arith.select %101, %108, %109 : vector<8x128xi1>, vector<8x128xf32>
      %cst_46 = arith.constant dense<0.000000e+00> : vector<8xf32>
      %111 = vector.multi_reduction <add>, %110, %cst_46 [1] : vector<8x128xf32> to vector<8xf32>
      %112 = vector.shape_cast %111 : vector<8xf32> to vector<8x1xf32>
      %113 = tpu.reciprocal %112 {approx = true} : vector<8x1xf32> -> vector<8x1xf32>
      %114 = arith.mulf %112, %113 : vector<8x1xf32>
      %cst_47 = arith.constant 2.000000e+00 : f32
      %115 = vector.broadcast %cst_47 : f32 to vector<8x1xf32>
      %116 = arith.subf %115, %114 : vector<8x1xf32>
      %117 = arith.mulf %113, %116 : vector<8x1xf32>
      %118 = vector.broadcast %117 : vector<8x1xf32> to vector<8x128xf32>
      %119 = arith.mulf %110, %118 : vector<8x128xf32>
      %c0_48 = arith.constant 0 : index
      %c0_49 = arith.constant 0 : index
      %120 = vector.load %arg7[%c0_48, %c0_49] : memref<8x128xf32, #tpu.memory_space<vmem>>, vector<8x128xf32>
      tpu.vector_store %arg7[%c0_48, %c0_49], %119 {strides = array<i32>} : memref<8x128xf32, #tpu.memory_space<vmem>>, vector<8x128xf32>,
    } else {
    }
    return
  }
  func.func @transform_0(%arg0: i32, %arg1: i32) -> (i32, i32) {
    %c0_i32 = arith.constant 0 : i32
    return %arg0, %arg1 : i32, i32
  }
  func.func @transform_1(%arg0: i32, %arg1: i32) -> (i32, i32) {
    %c0_i32 = arith.constant 0 : i32
    %c0_i32_0 = arith.constant 0 : i32
    %c0_i32_1 = arith.constant 0 : i32
    return %c0_i32, %c0_i32_0 : i32, i32
  }
  func.func @transform_2(%arg0: i32, %arg1: i32) -> (i32, i32) {
    %c0_i32 = arith.constant 0 : i32
    %c0_i32_0 = arith.constant 0 : i32
    %c0_i32_1 = arith.constant 0 : i32
    return %c0_i32, %c0_i32_0 : i32, i32
  }
  func.func @transform_3(%arg0: i32, %arg1: i32) -> (i32, i32) {
    %c0_i32 = arith.constant 0 : i32
    %c0_i32_0 = arith.constant 0 : i32
    %c0_i32_1 = arith.constant 0 : i32
    return %c0_i32, %c0_i32_0 : i32, i32
  }
  func.func @transform_4(%arg0: i32, %arg1: i32) -> (i32, i32) {
    %c0_i32 = arith.constant 0 : i32
    %c0_i32_0 = arith.constant 0 : i32
    %c0_i32_1 = arith.constant 0 : i32
    return %c0_i32, %c0_i32_0 : i32, i32
  }
  func.func @transform_5(%arg0: i32, %arg1: i32) -> (i32, i32) {
    %c0_i32 = arith.constant 0 : i32
    %c0_i32_0 = arith.constant 0 : i32
    return %arg0, %c0_i32 : i32, i32
  }
}

</mosaic_0001>

<bundles_post_ra>
// kernel: tpu_custom_call.1
= control target key start
LH: loop header
LB: loop body
LE: loop exit
PB: predicated region body
PF: predicated region fallthrough
CT: control target
= control target key end

     0   :  { %10 = vsyncpa [#allocation4], 0  ;;  %s1475_s0 = inlined_call_operand.hbm [shape: s32[8,8], index: 0, kind: input, shape index: {}]   ;;  %s1476_s1 = inlined_call_operand.hbm [shape: f32[32,32], index: 1, kind: input, shape index: {}]   ;;  %s1477_s2 = inlined_call_operand.vmem [shape: f32[1,32], index: 2, kind: input, shape index: {}]   ;;  %s1478_s3 = inlined_call_operand.hbm [shape: f32[32,128], index: 3, kind: input, shape index: {}]   ;;  %s1479_s4 = inlined_call_operand.vmem [shape: f32[1,128], index: 4, kind: input, shape index: {}]   ;;  %s1480_s5 = inlined_call_operand.hbm [shape: f32[8,128], index: 5, kind: output, shape index: {}]  }
   0x1   :  { %11 = vsyncpa [#allocation7], 0 }
   0x2   :  { %12 = vsyncpa [#allocation5], 0  ;;  %s1271_s18 = smov [#allocation6]   ;;  %s1177_s22 = scalar_lea.hbm %s1476_s1, 512 }
   0x3   :  { %s28_s19 = sshll.u32 %s1271_s18, 4  ;;  %p1178_p0 = scmp.ne.s32.totalorder %s1476_s1, %s1177_s22  ;;  %s29_s19 = int_to_ptr.vmem [resolvable:$true] %s28_s19 }
   0x4   :  { %p1181_p1 = scmp.lt.u32.totalorder %s1177_s22, %s1476_s1 }
   0x6   :  { %p1183_p2 = pnand %p1181_p1, %p1178_p0 }
   0x8   :  { %1186 = shalt.err (!%p1183_p2)
}
   0x9   :  { %s1187_s27 = scalar_lea.vmem %s29_s19, 512  ;;  %p1192_p4 = scmp.lt.s32.totalorder %s29_s19, %s29_s19 }
   0xa   :  { %p1188_p3 = scmp.ne.s32.totalorder %s29_s19, %s1187_s27  ;;  %p1193_p5 = scmp.lt.s32.totalorder %s1187_s27, %s1187_s27 }
   0xc   :  { %p1194_p6 = por %p1193_p5, %p1192_p4 }
   0xe   :  { %p1195_p7 = pnand %p1194_p6, %p1188_p3 }
  0x10   :  { %1198 = shalt.err (!%p1195_p7)
}
  0x11   :  { %s1272_s28 = smov 128   ;;  %s1273_s29 = smov 8  }
  0x12   :  { %34 = dma.hbm_to_vmem [thread:$0]  %s1476_s1, 512, %s29_s19, [#allocation7], %s1272_s28, %s1272_s28, %s1273_s29  }
  0x13   :  { %s1274_s7 = smov [#allocation3]   ;;  %s1275_s9 = smov [#allocation8]  }
  0x14   :  { %s19_s8 = sshll.u32 %s1274_s7, 4  ;;  %s42_s10 = sshll.u32 %s1275_s9, 4  ;;  %s20_s8 = int_to_ptr.vmem [resolvable:$true] %s19_s8  ;;  %s43_s10 = int_to_ptr.vmem [resolvable:$true] %s42_s10 }
  0x15   :  { %s1199_s13 = scalar_lea.hbm %s1475_s0, 128 }
  0x16   :  { %p1200_p8 = scmp.ne.s32.totalorder %s1475_s0, %s1199_s13  ;;  %p1203_p9 = scmp.lt.u32.totalorder %s1199_s13, %s1475_s0 }
  0x18   :  { %p1205_p10 = pnand %p1203_p9, %p1200_p8 }
  0x1a   :  { %1208 = shalt.err (!%p1205_p10)
}
  0x1b   :  { %s1209_s1 = scalar_lea.vmem %s20_s8, 128  ;;  %p1214_p12 = scmp.lt.s32.totalorder %s20_s8, %s20_s8 }
  0x1c   :  { %p1210_p11 = scmp.ne.s32.totalorder %s20_s8, %s1209_s1  ;;  %p1215_p13 = scmp.lt.s32.totalorder %s1209_s1, %s1209_s1 }
  0x1e   :  { %p1216_p0 = por %p1215_p13, %p1214_p12 }
  0x20   :  { %p1217_p1 = pnand %p1216_p0, %p1210_p11 }
  0x22   :  { %1220 = shalt.err (!%p1217_p1)
}
  0x23   :  { %22 = dma.hbm_to_vmem [thread:$0]  %s1475_s0, 128, %s20_s8, [#allocation4]  }
  0x24   :  { %s1221_s22 = scalar_lea.hbm %s1478_s3, 512 }
  0x25   :  { %p1222_p2 = scmp.ne.s32.totalorder %s1478_s3, %s1221_s22  ;;  %p1225_p3 = scmp.lt.u32.totalorder %s1221_s22, %s1478_s3 }
  0x27   :  { %p1227_p4 = pnand %p1225_p3, %p1222_p2 }
  0x29   :  { %1230 = shalt.err (!%p1227_p4)
}
  0x2a   :  { %s1231_s27 = scalar_lea.vmem %s43_s10, 512  ;;  %p1236_p6 = scmp.lt.s32.totalorder %s43_s10, %s43_s10 }
  0x2b   :  { %p1232_p5 = scmp.ne.s32.totalorder %s43_s10, %s1231_s27  ;;  %p1237_p7 = scmp.lt.s32.totalorder %s1231_s27, %s1231_s27 }
  0x2d   :  { %p1238_p8 = por %p1237_p7, %p1236_p6 }
  0x2f   :  { %p1239_p9 = pnand %p1238_p8, %p1232_p5 }
  0x31   :  { %1242 = shalt.err (!%p1239_p9)
}
  0x32   :  { %48 = dma.hbm_to_vmem [thread:$0]  %s1478_s3, 512, %s43_s10, [#allocation7], %s1272_s28, %s1272_s28, %s1273_s29  }
  0x33   :  { %1265 = dma.done.wait [#allocation4], 128  }
  0x34   :  { %1266 = vsyncadd [#allocation4], 4294967168 }
  0x35   :  { %1267 = dma.done.wait [#allocation7], 1024  }
  0x36   :  { %1268 = vsyncadd [#allocation7], 4294966272  ;;  %v72_v0 = vlaneseq  ;;  %v1276_v1 = vmov 0.0|0.0   ;;  %vm64_vm0 = vcmask 261120   ;;  %vm1277_vm1 = vmmov 0   ;;  %v71_v8 = vld [vmem:[#allocation3] sm:$0xff] }
  0x37   :  { %1110 = vmatprep.subr.bf16.mxu0 %v1276_v1  ;;  %1116 = vmatprep.subr.bf16.mxu1 %v1276_v1  ;;  %v1278_v3 = vmov 0.0   ;;  %v66_v9 = vld [vmem:[#allocation6] sm:$0xff]  ;;  %v67_v10 = vld [vmem:[#allocation6 + $0x8] sm:$0xff]  ;;  %v68_v14 = vld [vmem:[#allocation6 + $0x10] sm:$0xff]  ;;  %vm810_vm10 = vcmask 1040384   ;;  %vm812_vm11 = vcmask 1041408  }
  0x38   :  { %v75_v2 = vshrl.u32 %v72_v0, 7  ;;  %1019 = vmatprep.mubr.msk.f32.mxu0 %vm1277_vm1, %v1278_v3  ;;  %65 = vst.msk [vmem:[#allocation2] sm:$0xff] %vm64_vm0, %v1278_v3  ;;  %1030 = vmatprep.mubr.msk.f32.mxu1 %vm1277_vm1, %v1278_v3  ;;  %v69_v15 = vld [vmem:[#allocation6 + $0x18] sm:$0xff]  ;;  %v1360_v19 = vpack.c.bf16 %v67_v10, %v66_v9  ;;  %v1372_v27 = vand.u32 127, %v72_v0  ;;  %v831_v44 = vld [vmem:[#allocation8] sm:$0xff]  ;;  %v832_v45 = vld [vmem:[#allocation8 + $0x8] sm:$0xff] }
  0x39   :  { %v1363_v20 = vpack.c.bf16 %v69_v15, %v68_v14  ;;  %v833_v46 = vld [vmem:[#allocation8 + $0x10] sm:$0xff]  ;;  %v1159_v47 = vpack.c.bf16 %v832_v45, %v831_v44  ;;  %v834_v48 = vld [vmem:[#allocation8 + $0x18] sm:$0xff]  ;;  %vm814_vm12 = vcmask 1042432   ;;  %vm816_vm13 = vcmask 1043456  }
  0x3a   :  { %v76_v4 = vsub.s32 0, %v75_v2  ;;  %v90_v5 = vsub.s32 2, %v75_v2  ;;  %v83_v6 = vsub.s32 1, %v75_v2  ;;  %v97_v7 = vsub.s32 3, %v75_v2  ;;  %1112 = vmatpush3.bf16.msra.mxu0 %v1360_v19  ;;  %1118 = vmatpush3.bf16.msra.mxu1 %v1360_v19  ;;  %v1439_v50 = vld [vmem:[%s1477_s2] ss:$0 sm:$0xff] }
  0x3b   :  { %v104_v13 = vsub.s32 4, %v75_v2  ;;  %v111_v18 = vsub.s32 5, %v75_v2  ;;  %1113 = vmatprep.subr.bf16.mxu0 %v1276_v1  ;;  %1119 = vmatprep.subr.bf16.mxu1 %v1276_v1  ;;  %v118_v23 = vsub.s32 6, %v75_v2  ;;  %v125_v24 = vsub.s32 7, %v75_v2 }
  0x3c   :  { %v77_v11 = vrot.slane %v71_v8, %v76_v4  ;;  %v91_v12 = vrot.slane %v71_v8, %v90_v5  ;;  %v84_v16 = vrot.slane %v71_v8, %v83_v6  ;;  %v98_v17 = vrot.slane %v71_v8, %v97_v7 }
  0x3d   :  { %v105_v21 = vrot.slane %v71_v8, %v104_v13  ;;  %v112_v22 = vrot.slane %v71_v8, %v111_v18  ;;  %v119_v25 = vrot.slane %v71_v8, %v118_v23  ;;  %v126_v26 = vrot.slane %v71_v8, %v125_v24 }
  0x3e   :  { %79 = vbcast.lane.b32.xlu0 %v77_v11, 256  ;;  %93 = vbcast.lane.b32.xlu1 %v91_v12, 256  ;;  %v1162_v49 = vpack.c.bf16 %v834_v48, %v833_v46  ;;  %vm818_vm14 = vcmask 1044480   ;;  %vm820_vm15 = vcmask 1045504  }
  0x3f   :  { %1115 = vmatpush3.bf16.msra.mxu0 %v1363_v20  ;;  %1121 = vmatpush3.bf16.msra.mxu1 %v1363_v20 }
  0x40   :  { %1122 = vmatprep.subr.bf16.mxu0 %v1276_v1  ;;  %1128 = vmatprep.subr.bf16.mxu1 %v1276_v1 }
  0x42   :  { %86 = vbcast.lane.b32.xlu0 %v84_v16, 256  ;;  %100 = vbcast.lane.b32.xlu1 %v98_v17, 256 }
  0x46   :  { %107 = vbcast.lane.b32.xlu0 %v105_v21, 256  ;;  %114 = vbcast.lane.b32.xlu1 %v112_v22, 256 }
  0x4a   :  { %121 = vbcast.lane.b32.xlu0 %v119_v25, 256  ;;  %128 = vbcast.lane.b32.xlu1 %v126_v26, 256 }
  0xb0   :  { %v80_v28 = vpop.permute.xlu0 %79  ;;  %v94_v29 = vpop.permute.xlu1 %93 }
  0xb1   :  { %vm130_vm2 = vcmp.eq.s32.totalorder %v80_v28, %v1372_v27  ;;  %vm132_vm4 = vcmp.eq.s32.totalorder %v94_v29, %v1372_v27 }
  0xb2   :  { %v947_v30 = vsel %vm130_vm2, 1.0, %v1278_v3  ;;  %v949_v34 = vsel %vm132_vm4, 1.0, %v1278_v3  ;;  %vm915_vm2 = vcmp.lt.s32.totalorder %v1372_v27, 3 }
  0xb3   :  { %1020 = vmatmul.mubr.msk.f32.vlgmr.msra.gmra.mrb[0].mxu0 %vm64_vm0, %v947_v30 }
  0xb4   :  { %1124 = vmatpush3.bf16.msra.mxu0 %v1360_v19  ;;  %v87_v31 = vpop.permute.xlu0 %86  ;;  %1041 = vmatprep.mubr.msk.f32.mxu0 %vm1277_vm1, %v1278_v3  ;;  %v101_v33 = vpop.permute.xlu1 %100 }
  0xb5   :  { %vm131_vm3 = vcmp.eq.s32.totalorder %v87_v31, %v1372_v27  ;;  %1125 = vmatprep.subr.bf16.mxu0 %v1276_v1  ;;  %vm133_vm5 = vcmp.eq.s32.totalorder %v101_v33, %v1372_v27 }
  0xb6   :  { %v948_v32 = vsel %vm131_vm3, 1.0, %v1278_v3  ;;  %v950_v36 = vsel %vm133_vm5, 1.0, %v1278_v3 }
  0xb7   :  { %1031 = vmatmul.mubr.msk.f32.vlgmr.msra.gmra.mrb[0].mxu1 %vm64_vm0, %v948_v32 }
  0xb8   :  { %1127 = vmatpush3.bf16.msra.mxu0 %v1363_v20  ;;  %1130 = vmatpush3.bf16.msra.mxu1 %v1360_v19  ;;  %v108_v35 = vpop.permute.xlu0 %107  ;;  %v115_v37 = vpop.permute.xlu1 %114 }
  0xb9   :  { %1131 = vmatprep.subr.bf16.mxu1 %v1276_v1  ;;  %1134 = vmatprep.subr.bf16.mxu0 %v1276_v1  ;;  %vm134_vm6 = vcmp.eq.s32.totalorder %v108_v35, %v1372_v27  ;;  %vm135_vm7 = vcmp.eq.s32.totalorder %v115_v37, %v1372_v27 }
  0xba   :  { %1052 = vmatprep.mubr.msk.f32.mxu1 %vm1277_vm1, %v1278_v3  ;;  %v951_v38 = vsel %vm134_vm6, 1.0, %v1278_v3  ;;  %v952_v40 = vsel %vm135_vm7, 1.0, %v1278_v3 }
  0xbb   :  { %1042 = vmatmul.mubr.msk.f32.vlgmr.msra.gmra.mrb[2].mxu0 %vm64_vm0, %v949_v34 }
  0xbc   :  { %1133 = vmatpush3.bf16.msra.mxu1 %v1363_v20  ;;  %1136 = vmatpush3.bf16.msra.mxu0 %v1360_v19  ;;  %v122_v39 = vpop.permute.xlu0 %121  ;;  %v129_v41 = vpop.permute.xlu1 %128 }
  0xbd   :  { %1137 = vmatprep.subr.bf16.mxu0 %v1276_v1  ;;  %1140 = vmatprep.subr.bf16.mxu1 %v1276_v1  ;;  %vm136_vm8 = vcmp.eq.s32.totalorder %v122_v39, %v1372_v27  ;;  %vm137_vm9 = vcmp.eq.s32.totalorder %v129_v41, %v1372_v27 }
  0xbe   :  { %1063 = vmatprep.mubr.msk.f32.mxu0 %vm1277_vm1, %v1278_v3  ;;  %v953_v42 = vsel %vm136_vm8, 1.0, %v1278_v3  ;;  %v954_v43 = vsel %vm137_vm9, 1.0, %v1278_v3 }
  0xbf   :  { %1053 = vmatmul.mubr.msk.f32.vlgmr.msra.gmra.mrb[2].mxu1 %vm64_vm0, %v950_v36 }
  0xc0   :  { %1139 = vmatpush3.bf16.msra.mxu0 %v1363_v20  ;;  %1142 = vmatpush3.bf16.msra.mxu1 %v1360_v19 }
  0xc1   :  { %1143 = vmatprep.subr.bf16.mxu1 %v1276_v1  ;;  %1146 = vmatprep.subr.bf16.mxu0 %v1276_v1 }
  0xc2   :  { %1074 = vmatprep.mubr.msk.f32.mxu1 %vm1277_vm1, %v1278_v3 }
  0xc3   :  { %1064 = vmatmul.mubr.msk.f32.vlgmr.msra.gmra.mrb[4].mxu0 %vm64_vm0, %v951_v38 }
  0xc4   :  { %1145 = vmatpush3.bf16.msra.mxu1 %v1363_v20  ;;  %1148 = vmatpush3.bf16.msra.mxu0 %v1360_v19 }
  0xc5   :  { %1149 = vmatprep.subr.bf16.mxu0 %v1276_v1  ;;  %1152 = vmatprep.subr.bf16.mxu1 %v1276_v1 }
  0xc6   :  { %1085 = vmatprep.mubr.msk.f32.mxu0 %vm1277_vm1, %v1278_v3 }
  0xc7   :  { %1075 = vmatmul.mubr.msk.f32.vlgmr.msra.gmra.mrb[4].mxu1 %vm64_vm0, %v952_v40 }
  0xc8   :  { %1151 = vmatpush3.bf16.msra.mxu0 %v1363_v20  ;;  %1154 = vmatpush3.bf16.msra.mxu1 %v1360_v19 }
  0xc9   :  { %1155 = vmatprep.subr.bf16.mxu1 %v1276_v1  ;;  %1096 = vmatprep.mubr.msk.f32.mxu1 %vm1277_vm1, %v1278_v3 }
  0xca   :  { %1158 = vmatprep.subr.bf16.mxu0 %v1276_v1 }
  0xcb   :  { %1086 = vmatmul.mubr.msk.f32.vlgmr.msra.gmra.mrb[6].mxu0 %vm64_vm0, %v953_v42 }
  0xcc   :  { %1157 = vmatpush3.bf16.msra.mxu1 %v1363_v20  ;;  %1107 = vmatprep.mubr.msk.f32.mxu0 %vm1277_vm1, %v1278_v3  ;;  %vm822_vm1 = vcmask 1046528  }
  0xcd   :  { %1160 = vmatpush3.bf16.msra.mxu0 %v1159_v47 }
  0xce   :  { %1161 = vmatprep.subr.bf16.mxu0 %v1276_v1 }
  0xcf   :  { %1097 = vmatmul.mubr.msk.f32.vlgmr.msra.gmra.mrb[6].mxu1 %vm64_vm0, %v954_v43 }
  0xd1   :  { %1163 = vmatpush3.bf16.msra.mxu0 %v1162_v49 }
 0x186   :  { %v230_v51 = vpop.f32.mrb[0].mxu0 }
 0x187   :  { %v231_v52 = vadd.f32 %v1439_v50, %v230_v51  ;;  %v1021_v53 = vpop.f32.mrb[1].mxu0 }
 0x189   :  { %v234_v54 = vmax.f32 %v231_v52, 0.0 }
 0x18a   :  { %v311_v55 = vpop.f32.mrb[0].mxu1 }
 0x18b   :  { %v235_v56 = vsel %vm64_vm0, %v234_v54, 0.0  ;;  %v312_v57 = vadd.f32 %v1439_v50, %v311_v55  ;;  %v1032_v58 = vpop.f32.mrb[1].mxu1 }
 0x18c   :  { %v236_v59 = vrot.slane %v235_v56, 4 }
 0x18d   :  { %v315_v60 = vmax.f32 %v312_v57, 0.0 }
 0x18e   :  { %v237_v61 = vadd.f32 %v236_v59, %v235_v56  ;;  %v392_v62 = vpop.f32.mrb[2].mxu0 }
 0x18f   :  { %v316_v63 = vsel %vm64_vm0, %v315_v60, 0.0  ;;  %v393_v0 = vadd.f32 %v1439_v50, %v392_v62  ;;  %v1043_v1 = vpop.f32.mrb[3].mxu0 }
 0x190   :  { %v238_v2 = vrot.slane %v237_v61, 2  ;;  %v317_v3 = vrot.slane %v316_v63, 4 }
 0x191   :  { %v396_v4 = vmax.f32 %v393_v0, 0.0 }
 0x192   :  { %v239_v5 = vadd.f32 %v238_v2, %v237_v61  ;;  %v318_v6 = vadd.f32 %v317_v3, %v316_v63  ;;  %v473_v7 = vpop.f32.mrb[2].mxu1 }
 0x193   :  { %v397_v8 = vsel %vm64_vm0, %v396_v4, 0.0  ;;  %v474_v9 = vadd.f32 %v1439_v50, %v473_v7  ;;  %v1054_v10 = vpop.f32.mrb[3].mxu1 }
 0x194   :  { %v319_v11 = vrot.slane %v318_v6, 2  ;;  %v398_v12 = vrot.slane %v397_v8, 4  ;;  %v240_v14 = vrot.slane %v239_v5, 1 }
 0x195   :  { %v477_v13 = vmax.f32 %v474_v9, 0.0 }
 0x196   :  { %v320_v15 = vadd.f32 %v319_v11, %v318_v6  ;;  %v399_v16 = vadd.f32 %v398_v12, %v397_v8  ;;  %v554_v17 = vpop.f32.mrb[4].mxu0  ;;  %v241_v25 = vadd.f32 %v240_v14, %v239_v5 }
 0x197   :  { %v478_v18 = vsel %vm64_vm0, %v477_v13, 0.0  ;;  %v555_v19 = vadd.f32 %v1439_v50, %v554_v17  ;;  %v1065_v20 = vpop.f32.mrb[5].mxu0 }
 0x198   :  { %v321_v21 = vrot.slane %v320_v15, 1  ;;  %v400_v22 = vrot.slane %v399_v16, 2  ;;  %v479_v23 = vrot.slane %v478_v18, 4 }
 0x199   :  { %v558_v24 = vmax.f32 %v555_v19, 0.0 }
 0x19a   :  { %v322_v26 = vadd.f32 %v321_v21, %v320_v15  ;;  %v401_v28 = vadd.f32 %v400_v22, %v399_v16  ;;  %v480_v29 = vadd.f32 %v479_v23, %v478_v18  ;;  %v635_v30 = vpop.f32.mrb[4].mxu1  ;;  %v809_v18 = vld [vmem:[#allocation2] sm:$0xff] }
 0x19b   :  { %v559_v31 = vsel %vm64_vm0, %v558_v24, 0.0  ;;  %v636_v32 = vadd.f32 %v1439_v50, %v635_v30  ;;  %v1076_v33 = vpop.f32.mrb[5].mxu1  ;;  %v964_v23 = vld [vmem:[%s1479_s4] ss:$0 sm:$0xff]  ;;  %s1279_s4 = smov [#allocation9]  }
 0x19c   :  { %v811_v34 = vsel %vm810_vm10, %v241_v25, %v322_v26  ;;  %v402_v35 = vrot.slane %v401_v28, 1  ;;  %v481_v36 = vrot.slane %v480_v29, 2  ;;  %v560_v37 = vrot.slane %v559_v31, 4  ;;  %s937_s6 = sshll.u32 %s1279_s4, 4  ;;  %s938_s6 = int_to_ptr.vmem [resolvable:$true] %s937_s6 }
 0x19d   :  { %v639_v38 = vmax.f32 %v636_v32, 0.0  ;;  %s1243_s7 = scalar_lea.vmem %s938_s6, 128  ;;  %p1248_p11 = scmp.lt.s32.totalorder %s938_s6, %s938_s6 }
 0x19e   :  { %v403_v39 = vadd.f32 %v402_v35, %v401_v28  ;;  %v482_v40 = vadd.f32 %v481_v36, %v480_v29  ;;  %v561_v41 = vadd.f32 %v560_v37, %v559_v31  ;;  %v716_v42 = vpop.f32.mrb[6].mxu0  ;;  %p1244_p10 = scmp.ne.s32.totalorder %s938_s6, %s1243_s7  ;;  %p1249_p12 = scmp.lt.s32.totalorder %s1243_s7, %s1243_s7 }
 0x19f   :  { %v640_v43 = vsel %vm64_vm0, %v639_v38, 0.0  ;;  %v717_v44 = vadd.f32 %v1439_v50, %v716_v42  ;;  %v1087_v45 = vpop.f32.mrb[7].mxu0 }
 0x1a0   :  { %v813_v46 = vsel %vm812_vm11, %v811_v34, %v403_v39  ;;  %v483_v47 = vrot.slane %v482_v40, 1  ;;  %v562_v48 = vrot.slane %v561_v41, 2  ;;  %v641_v49 = vrot.slane %v640_v43, 4  ;;  %p1250_p13 = por %p1249_p12, %p1248_p11 }
 0x1a1   :  { %v720_v51 = vmax.f32 %v717_v44, 0.0 }
 0x1a2   :  { %v484_v52 = vadd.f32 %v483_v47, %v482_v40  ;;  %v563_v53 = vadd.f32 %v562_v48, %v561_v41  ;;  %v642_v54 = vadd.f32 %v641_v49, %v640_v43  ;;  %v797_v55 = vpop.f32.mrb[6].mxu1  ;;  %p1251_p0 = pnand %p1250_p13, %p1244_p10 }
 0x1a3   :  { %v721_v56 = vsel %vm64_vm0, %v720_v51, 0.0  ;;  %v798_v57 = vadd.f32 %v1439_v50, %v797_v55  ;;  %v1098_v58 = vpop.f32.mrb[7].mxu1 }
 0x1a4   :  { %v815_v59 = vsel %vm814_vm12, %v813_v46, %v484_v52  ;;  %v564_v60 = vrot.slane %v563_v53, 1  ;;  %v643_v61 = vrot.slane %v642_v54, 2  ;;  %v722_v62 = vrot.slane %v721_v56, 4 }
 0x1a5   :  { %v801_v63 = vmax.f32 %v798_v57, 0.0 }
 0x1a6   :  { %v565_v0 = vadd.f32 %v564_v60, %v563_v53  ;;  %v644_v1 = vadd.f32 %v643_v61, %v642_v54  ;;  %v723_v2 = vadd.f32 %v722_v62, %v721_v56 }
 0x1a7   :  { %v802_v3 = vsel %vm64_vm0, %v801_v63, 0.0 }
 0x1a8   :  { %v817_v4 = vsel %vm816_vm13, %v815_v59, %v565_v0  ;;  %v645_v5 = vrot.slane %v644_v1, 1  ;;  %v724_v6 = vrot.slane %v723_v2, 2  ;;  %v803_v7 = vrot.slane %v802_v3, 4 }
 0x1aa   :  { %v646_v8 = vadd.f32 %v645_v5, %v644_v1  ;;  %v725_v9 = vadd.f32 %v724_v6, %v723_v2  ;;  %v804_v50 = vadd.f32 %v803_v7, %v802_v3 }
 0x1ac   :  { %v819_v10 = vsel %vm818_vm14, %v817_v4, %v646_v8  ;;  %v726_v11 = vrot.slane %v725_v9, 1  ;;  %v805_v12 = vrot.slane %v804_v50, 2 }
 0x1ae   :  { %v727_v13 = vadd.f32 %v726_v11, %v725_v9  ;;  %v806_v14 = vadd.f32 %v805_v12, %v804_v50 }
 0x1b0   :  { %v821_v15 = vsel %vm820_vm15, %v819_v10, %v727_v13  ;;  %v807_v16 = vrot.slane %v806_v14, 1 }
 0x1b2   :  { %v808_v17 = vadd.f32 %v807_v16, %v806_v14 }
 0x1b4   :  { %v823_v19 = vsel %vm822_vm1, %v821_v15, %v808_v17 }
 0x1b5   :  { %v824_v20 = vadd.f32 %v823_v19, %v809_v18 }
 0x1b7   :  { %825 = vst.msk [vmem:[#allocation2] sm:$0xff] %vm64_vm0, %v824_v20 }
 0x1be   :  { %v829_v21 = vld [vmem:[#allocation2] sm:$0xff] }
 0x1bf   :  { %v830_v22 = vmul.f32 0.125, %v829_v21 }
 0x1c1   :  { %1108 = vmatmul.mubr.msk.f32.vlgmr.msra.gmra.mrb[8].mxu0 %vm64_vm0, %v830_v22 }
 0x294   :  { %v911_v24 = vpop.f32.mrb[8].mxu0 }
 0x295   :  { %v912_v25 = vadd.f32 %v964_v23, %v911_v24  ;;  %v1109_v26 = vpop.f32.mrb[9].mxu0 }
 0x297   :  { %v916_v28 = vsel %vm915_vm2, %v912_v25, -1e+30 }
 0x298   :  { %917 = vmax.xlane.f32.xlu0 %v916_v28 }
 0x325   :  { %v918_v29 = vpop.xlane.xlu0 %917 }
 0x326   :  { %v919_v30 = vsub.f32 %v916_v28, %v918_v29 }
 0x328   :  { %v920_v31 = vmul.f32 1.442695, %v919_v30 }
 0x32a   :  { %1173 = vpow2.f32 %v920_v31 }
 0x334   :  { %v1174_v32 = vpop.eup %1173 }
 0x335   :  { %v922_v33 = vsel %vm915_vm2, %v1174_v32, 0.0 }
 0x336   :  { %923 = vadd.xlane.f32.xlu1 %v922_v33 }
 0x3c3   :  { %v924_v34 = vpop.xlane.xlu1 %923 }
 0x3c4   :  { %1175 = vrcp.f32 %v924_v34 }
 0x3ce   :  { %v1176_v35 = vpop.eup %1175 }
 0x3cf   :  { %v926_v36 = vmul.f32 %v1176_v35, %v924_v34 }
 0x3d1   :  { %v927_v37 = vsub.f32 2.0, %v926_v36 }
 0x3d3   :  { %v928_v38 = vmul.f32 %v1176_v35, %v927_v37 }
 0x3d5   :  { %v929_v27 = vmul.f32 %v928_v38, %v922_v33 }
 0x3d7   :  { %930 = vst [vmem:[#allocation9] sm:$0xff] %v929_v27 }
 0x3d8   :  { %1254 = shalt.err (!%p1251_p0)
}
 0x3d9   :  { %s1255_s10 = scalar_lea.hbm %s1480_s5, 128 }
 0x3da   :  { %p1256_p1 = scmp.ne.s32.totalorder %s1480_s5, %s1255_s10  ;;  %p1259_p2 = scmp.lt.u32.totalorder %s1255_s10, %s1480_s5 }
 0x3dc   :  { %p1261_p3 = pnand %p1259_p2, %p1256_p1 }
 0x3de   :  { %1264 = shalt.err (!%p1261_p3)
}
 0x3df   :  { %940 = dma.vmem_to_hbm [thread:$0]  %s938_s6, 128, %s1480_s5, [#allocation5]  }
 0x3e0   :  { %1269 = dma.done.wait [#allocation5], 128  }
 0x3e1   :  { %1270 = vsyncadd [#allocation5], 4294967168 }
 0x3e2   :  { %944 = vsyncpa [#allocation4], 1 }
 0x3e3   :  { %945 = vsyncpa [#allocation7], 1 }
 0x3e4   :  { %946 = vsyncpa [#allocation5], 1 }

// kernel: tpu_custom_call.1
= control target key start
LH: loop header
LB: loop body
LE: loop exit
PB: predicated region body
PF: predicated region fallthrough
CT: control target
= control target key end

     0   :  { %10 = vsyncpa [#allocation4], 0  ;;  %s1475_s0 = inlined_call_operand.hbm [shape: s32[8,8], index: 0, kind: input, shape index: {}]   ;;  %s1476_s1 = inlined_call_operand.hbm [shape: f32[32,32], index: 1, kind: input, shape index: {}]   ;;  %s1477_s2 = inlined_call_operand.vmem [shape: f32[1,32], index: 2, kind: input, shape index: {}]   ;;  %s1478_s3 = inlined_call_operand.hbm [shape: f32[32,128], index: 3, kind: input, shape index: {}]   ;;  %s1479_s4 = inlined_call_operand.vmem [shape: f32[1,128], index: 4, kind: input, shape index: {}]   ;;  %s1480_s5 = inlined_call_operand.hbm [shape: f32[8,128], index: 5, kind: output, shape index: {}]  }
   0x1   :  { %11 = vsyncpa [#allocation7], 0 }
   0x2   :  { %12 = vsyncpa [#allocation5], 0  ;;  %s1271_s18 = smov [#allocation6]   ;;  %s1177_s22 = scalar_lea.hbm %s1476_s1, 512 }
   0x3   :  { %s28_s19 = sshll.u32 %s1271_s18, 4  ;;  %p1178_p0 = scmp.ne.s32.totalorder %s1476_s1, %s1177_s22  ;;  %s29_s19 = int_to_ptr.vmem [resolvable:$true] %s28_s19 }
   0x4   :  { %p1181_p1 = scmp.lt.u32.totalorder %s1177_s22, %s1476_s1 }
   0x6   :  { %p1183_p2 = pnand %p1181_p1, %p1178_p0 }
   0x8   :  { %1186 = shalt.err (!%p1183_p2)
}
   0x9   :  { %s1187_s27 = scalar_lea.vmem %s29_s19, 512  ;;  %p1192_p4 = scmp.lt.s32.totalorder %s29_s19, %s29_s19 }
   0xa   :  { %p1188_p3 = scmp.ne.s32.totalorder %s29_s19, %s1187_s27  ;;  %p1193_p5 = scmp.lt.s32.totalorder %s1187_s27, %s1187_s27 }
   0xc   :  { %p1194_p6 = por %p1193_p5, %p1192_p4 }
   0xe   :  { %p1195_p7 = pnand %p1194_p6, %p1188_p3 }
  0x10   :  { %1198 = shalt.err (!%p1195_p7)
}
  0x11   :  { %s1272_s28 = smov 128   ;;  %s1273_s29 = smov 8  }
  0x12   :  { %34 = dma.hbm_to_vmem [thread:$0]  %s1476_s1, 512, %s29_s19, [#allocation7], %s1272_s28, %s1272_s28, %s1273_s29  }
  0x13   :  { %s1274_s7 = smov [#allocation3]   ;;  %s1275_s9 = smov [#allocation8]  }
  0x14   :  { %s19_s8 = sshll.u32 %s1274_s7, 4  ;;  %s42_s10 = sshll.u32 %s1275_s9, 4  ;;  %s20_s8 = int_to_ptr.vmem [resolvable:$true] %s19_s8  ;;  %s43_s10 = int_to_ptr.vmem [resolvable:$true] %s42_s10 }
  0x15   :  { %s1199_s13 = scalar_lea.hbm %s1475_s0, 128 }
  0x16   :  { %p1200_p8 = scmp.ne.s32.totalorder %s1475_s0, %s1199_s13  ;;  %p1203_p9 = scmp.lt.u32.totalorder %s1199_s13, %s1475_s0 }
  0x18   :  { %p1205_p10 = pnand %p1203_p9, %p1200_p8 }
  0x1a   :  { %1208 = shalt.err (!%p1205_p10)
}
  0x1b   :  { %s1209_s1 = scalar_lea.vmem %s20_s8, 128  ;;  %p1214_p12 = scmp.lt.s32.totalorder %s20_s8, %s20_s8 }
  0x1c   :  { %p1210_p11 = scmp.ne.s32.totalorder %s20_s8, %s1209_s1  ;;  %p1215_p13 = scmp.lt.s32.totalorder %s1209_s1, %s1209_s1 }
  0x1e   :  { %p1216_p0 = por %p1215_p13, %p1214_p12 }
  0x20   :  { %p1217_p1 = pnand %p1216_p0, %p1210_p11 }
  0x22   :  { %1220 = shalt.err (!%p1217_p1)
}
  0x23   :  { %22 = dma.hbm_to_vmem [thread:$0]  %s1475_s0, 128, %s20_s8, [#allocation4]  }
  0x24   :  { %s1221_s22 = scalar_lea.hbm %s1478_s3, 512 }
  0x25   :  { %p1222_p2 = scmp.ne.s32.totalorder %s1478_s3, %s1221_s22  ;;  %p1225_p3 = scmp.lt.u32.totalorder %s1221_s22, %s1478_s3 }
  0x27   :  { %p1227_p4 = pnand %p1225_p3, %p1222_p2 }
  0x29   :  { %1230 = shalt.err (!%p1227_p4)
}
  0x2a   :  { %s1231_s27 = scalar_lea.vmem %s43_s10, 512  ;;  %p1236_p6 = scmp.lt.s32.totalorder %s43_s10, %s43_s10 }
  0x2b   :  { %p1232_p5 = scmp.ne.s32.totalorder %s43_s10, %s1231_s27  ;;  %p1237_p7 = scmp.lt.s32.totalorder %s1231_s27, %s1231_s27 }
  0x2d   :  { %p1238_p8 = por %p1237_p7, %p1236_p6 }
  0x2f   :  { %p1239_p9 = pnand %p1238_p8, %p1232_p5 }
  0x31   :  { %1242 = shalt.err (!%p1239_p9)
}
  0x32   :  { %48 = dma.hbm_to_vmem [thread:$0]  %s1478_s3, 512, %s43_s10, [#allocation7], %s1272_s28, %s1272_s28, %s1273_s29  }
  0x33   :  { %1265 = dma.done.wait [#allocation4], 128  }
  0x34   :  { %1266 = vsyncadd [#allocation4], 4294967168 }
  0x35   :  { %1267 = dma.done.wait [#allocation7], 1024  }
  0x36   :  { %1268 = vsyncadd [#allocation7], 4294966272  ;;  %v72_v0 = vlaneseq  ;;  %v1276_v1 = vmov 0.0|0.0   ;;  %vm64_vm0 = vcmask 261120   ;;  %vm1277_vm1 = vmmov 0   ;;  %v71_v8 = vld [vmem:[#allocation3] sm:$0xff] }
  0x37   :  { %1110 = vmatprep.subr.bf16.mxu0 %v1276_v1  ;;  %1116 = vmatprep.subr.bf16.mxu1 %v1276_v1  ;;  %v1278_v3 = vmov 0.0   ;;  %v66_v9 = vld [vmem:[#allocation6] sm:$0xff]  ;;  %v67_v10 = vld [vmem:[#allocation6 + $0x8] sm:$0xff]  ;;  %v68_v14 = vld [vmem:[#allocation6 + $0x10] sm:$0xff]  ;;  %vm810_vm10 = vcmask 1040384   ;;  %vm812_vm11 = vcmask 1041408  }
  0x38   :  { %v75_v2 = vshrl.u32 %v72_v0, 7  ;;  %1019 = vmatprep.mubr.msk.f32.mxu0 %vm1277_vm1, %v1278_v3  ;;  %65 = vst.msk [vmem:[#allocation2] sm:$0xff] %vm64_vm0, %v1278_v3  ;;  %1030 = vmatprep.mubr.msk.f32.mxu1 %vm1277_vm1, %v1278_v3  ;;  %v69_v15 = vld [vmem:[#allocation6 + $0x18] sm:$0xff]  ;;  %v1360_v19 = vpack.c.bf16 %v67_v10, %v66_v9  ;;  %v1372_v27 = vand.u32 127, %v72_v0  ;;  %v831_v44 = vld [vmem:[#allocation8] sm:$0xff]  ;;  %v832_v45 = vld [vmem:[#allocation8 + $0x8] sm:$0xff] }
  0x39   :  { %v1363_v20 = vpack.c.bf16 %v69_v15, %v68_v14  ;;  %v833_v46 = vld [vmem:[#allocation8 + $0x10] sm:$0xff]  ;;  %v1159_v47 = vpack.c.bf16 %v832_v45, %v831_v44  ;;  %v834_v48 = vld [vmem:[#allocation8 + $0x18] sm:$0xff]  ;;  %vm814_vm12 = vcmask 1042432   ;;  %vm816_vm13 = vcmask 1043456  }
  0x3a   :  { %v76_v4 = vsub.s32 0, %v75_v2  ;;  %v90_v5 = vsub.s32 2, %v75_v2  ;;  %v83_v6 = vsub.s32 1, %v75_v2  ;;  %v97_v7 = vsub.s32 3, %v75_v2  ;;  %1112 = vmatpush3.bf16.msra.mxu0 %v1360_v19  ;;  %1118 = vmatpush3.bf16.msra.mxu1 %v1360_v19  ;;  %v1439_v50 = vld [vmem:[%s1477_s2] ss:$0 sm:$0xff] }
  0x3b   :  { %v104_v13 = vsub.s32 4, %v75_v2  ;;  %v111_v18 = vsub.s32 5, %v75_v2  ;;  %1113 = vmatprep.subr.bf16.mxu0 %v1276_v1  ;;  %1119 = vmatprep.subr.bf16.mxu1 %v1276_v1  ;;  %v118_v23 = vsub.s32 6, %v75_v2  ;;  %v125_v24 = vsub.s32 7, %v75_v2 }
  0x3c   :  { %v77_v11 = vrot.slane %v71_v8, %v76_v4  ;;  %v91_v12 = vrot.slane %v71_v8, %v90_v5  ;;  %v84_v16 = vrot.slane %v71_v8, %v83_v6  ;;  %v98_v17 = vrot.slane %v71_v8, %v97_v7 }
  0x3d   :  { %v105_v21 = vrot.slane %v71_v8, %v104_v13  ;;  %v112_v22 = vrot.slane %v71_v8, %v111_v18  ;;  %v119_v25 = vrot.slane %v71_v8, %v118_v23  ;;  %v126_v26 = vrot.slane %v71_v8, %v125_v24 }
  0x3e   :  { %79 = vbcast.lane.b32.xlu0 %v77_v11, 256  ;;  %93 = vbcast.lane.b32.xlu1 %v91_v12, 256  ;;  %v1162_v49 = vpack.c.bf16 %v834_v48, %v833_v46  ;;  %vm818_vm14 = vcmask 1044480   ;;  %vm820_vm15 = vcmask 1045504  }
  0x3f   :  { %1115 = vmatpush3.bf16.msra.mxu0 %v1363_v20  ;;  %1121 = vmatpush3.bf16.msra.mxu1 %v1363_v20 }
  0x40   :  { %1122 = vmatprep.subr.bf16.mxu0 %v1276_v1  ;;  %1128 = vmatprep.subr.bf16.mxu1 %v1276_v1 }
  0x42   :  { %86 = vbcast.lane.b32.xlu0 %v84_v16, 256  ;;  %100 = vbcast.lane.b32.xlu1 %v98_v17, 256 }
  0x46   :  { %107 = vbcast.lane.b32.xlu0 %v105_v21, 256  ;;  %114 = vbcast.lane.b32.xlu1 %v112_v22, 256 }
  0x4a   :  { %121 = vbcast.lane.b32.xlu0 %v119_v25, 256  ;;  %128 = vbcast.lane.b32.xlu1 %v126_v26, 256 }
  0xb0   :  { %v80_v28 = vpop.permute.xlu0 %79  ;;  %v94_v29 = vpop.permute.xlu1 %93 }
  0xb1   :  { %vm130_vm2 = vcmp.eq.s32.totalorder %v80_v28, %v1372_v27  ;;  %vm132_vm4 = vcmp.eq.s32.totalorder %v94_v29, %v1372_v27 }
  0xb2   :  { %v947_v30 = vsel %vm130_vm2, 1.0, %v1278_v3  ;;  %v949_v34 = vsel %vm132_vm4, 1.0, %v1278_v3  ;;  %vm915_vm2 = vcmp.lt.s32.totalorder %v1372_v27, 3 }
  0xb3   :  { %1020 = vmatmul.mubr.msk.f32.vlgmr.msra.gmra.mrb[0].mxu0 %vm64_vm0, %v947_v30 }
  0xb4   :  { %1124 = vmatpush3.bf16.msra.mxu0 %v1360_v19  ;;  %v87_v31 = vpop.permute.xlu0 %86  ;;  %1041 = vmatprep.mubr.msk.f32.mxu0 %vm1277_vm1, %v1278_v3  ;;  %v101_v33 = vpop.permute.xlu1 %100 }
  0xb5   :  { %vm131_vm3 = vcmp.eq.s32.totalorder %v87_v31, %v1372_v27  ;;  %1125 = vmatprep.subr.bf16.mxu0 %v1276_v1  ;;  %vm133_vm5 = vcmp.eq.s32.totalorder %v101_v33, %v1372_v27 }
  0xb6   :  { %v948_v32 = vsel %vm131_vm3, 1.0, %v1278_v3  ;;  %v950_v36 = vsel %vm133_vm5, 1.0, %v1278_v3 }
  0xb7   :  { %1031 = vmatmul.mubr.msk.f32.vlgmr.msra.gmra.mrb[0].mxu1 %vm64_vm0, %v948_v32 }
  0xb8   :  { %1127 = vmatpush3.bf16.msra.mxu0 %v1363_v20  ;;  %1130 = vmatpush3.bf16.msra.mxu1 %v1360_v19  ;;  %v108_v35 = vpop.permute.xlu0 %107  ;;  %v115_v37 = vpop.permute.xlu1 %114 }
  0xb9   :  { %1131 = vmatprep.subr.bf16.mxu1 %v1276_v1  ;;  %1134 = vmatprep.subr.bf16.mxu0 %v1276_v1  ;;  %vm134_vm6 = vcmp.eq.s32.totalorder %v108_v35, %v1372_v27  ;;  %vm135_vm7 = vcmp.eq.s32.totalorder %v115_v37, %v1372_v27 }
  0xba   :  { %1052 = vmatprep.mubr.msk.f32.mxu1 %vm1277_vm1, %v1278_v3  ;;  %v951_v38 = vsel %vm134_vm6, 1.0, %v1278_v3  ;;  %v952_v40 = vsel %vm135_vm7, 1.0, %v1278_v3 }
  0xbb   :  { %1042 = vmatmul.mubr.msk.f32.vlgmr.msra.gmra.mrb[2].mxu0 %vm64_vm0, %v949_v34 }
  0xbc   :  { %1133 = vmatpush3.bf16.msra.mxu1 %v1363_v20  ;;  %1136 = vmatpush3.bf16.msra.mxu0 %v1360_v19  ;;  %v122_v39 = vpop.permute.xlu0 %121  ;;  %v129_v41 = vpop.permute.xlu1 %128 }
  0xbd   :  { %1137 = vmatprep.subr.bf16.mxu0 %v1276_v1  ;;  %1140 = vmatprep.subr.bf16.mxu1 %v1276_v1  ;;  %vm136_vm8 = vcmp.eq.s32.totalorder %v122_v39, %v1372_v27  ;;  %vm137_vm9 = vcmp.eq.s32.totalorder %v129_v41, %v1372_v27 }
  0xbe   :  { %1063 = vmatprep.mubr.msk.f32.mxu0 %vm1277_vm1, %v1278_v3  ;;  %v953_v42 = vsel %vm136_vm8, 1.0, %v1278_v3  ;;  %v954_v43 = vsel %vm137_vm9, 1.0, %v1278_v3 }
  0xbf   :  { %1053 = vmatmul.mubr.msk.f32.vlgmr.msra.gmra.mrb[2].mxu1 %vm64_vm0, %v950_v36 }
  0xc0   :  { %1139 = vmatpush3.bf16.msra.mxu0 %v1363_v20  ;;  %1142 = vmatpush3.bf16.msra.mxu1 %v1360_v19 }
  0xc1   :  { %1143 = vmatprep.subr.bf16.mxu1 %v1276_v1  ;;  %1146 = vmatprep.subr.bf16.mxu0 %v1276_v1 }
  0xc2   :  { %1074 = vmatprep.mubr.msk.f32.mxu1 %vm1277_vm1, %v1278_v3 }
  0xc3   :  { %1064 = vmatmul.mubr.msk.f32.vlgmr.msra.gmra.mrb[4].mxu0 %vm64_vm0, %v951_v38 }
  0xc4   :  { %1145 = vmatpush3.bf16.msra.mxu1 %v1363_v20  ;;  %1148 = vmatpush3.bf16.msra.mxu0 %v1360_v19 }
  0xc5   :  { %1149 = vmatprep.subr.bf16.mxu0 %v1276_v1  ;;  %1152 = vmatprep.subr.bf16.mxu1 %v1276_v1 }
  0xc6   :  { %1085 = vmatprep.mubr.msk.f32.mxu0 %vm1277_vm1, %v1278_v3 }
  0xc7   :  { %1075 = vmatmul.mubr.msk.f32.vlgmr.msra.gmra.mrb[4].mxu1 %vm64_vm0, %v952_v40 }
  0xc8   :  { %1151 = vmatpush3.bf16.msra.mxu0 %v1363_v20  ;;  %1154 = vmatpush3.bf16.msra.mxu1 %v1360_v19 }
  0xc9   :  { %1155 = vmatprep.subr.bf16.mxu1 %v1276_v1  ;;  %1096 = vmatprep.mubr.msk.f32.mxu1 %vm1277_vm1, %v1278_v3 }
  0xca   :  { %1158 = vmatprep.subr.bf16.mxu0 %v1276_v1 }
  0xcb   :  { %1086 = vmatmul.mubr.msk.f32.vlgmr.msra.gmra.mrb[6].mxu0 %vm64_vm0, %v953_v42 }
  0xcc   :  { %1157 = vmatpush3.bf16.msra.mxu1 %v1363_v20  ;;  %1107 = vmatprep.mubr.msk.f32.mxu0 %vm1277_vm1, %v1278_v3  ;;  %vm822_vm1 = vcmask 1046528  }
  0xcd   :  { %1160 = vmatpush3.bf16.msra.mxu0 %v1159_v47 }
  0xce   :  { %1161 = vmatprep.subr.bf16.mxu0 %v1276_v1 }
  0xcf   :  { %1097 = vmatmul.mubr.msk.f32.vlgmr.msra.gmra.mrb[6].mxu1 %vm64_vm0, %v954_v43 }
  0xd1   :  { %1163 = vmatpush3.bf16.msra.mxu0 %v1162_v49 }
 0x186   :  { %v230_v51 = vpop.f32.mrb[0].mxu0 }
 0x187   :  { %v231_v52 = vadd.f32 %v1439_v50, %v230_v51  ;;  %v1021_v53 = vpop.f32.mrb[1].mxu0 }
 0x189   :  { %v234_v54 = vmax.f32 %v231_v52, 0.0 }
 0x18a   :  { %v311_v55 = vpop.f32.mrb[0].mxu1 }
 0x18b   :  { %v235_v56 = vsel %vm64_vm0, %v234_v54, 0.0  ;;  %v312_v57 = vadd.f32 %v1439_v50, %v311_v55  ;;  %v1032_v58 = vpop.f32.mrb[1].mxu1 }
 0x18c   :  { %v236_v59 = vrot.slane %v235_v56, 4 }
 0x18d   :  { %v315_v60 = vmax.f32 %v312_v57, 0.0 }
 0x18e   :  { %v237_v61 = vadd.f32 %v236_v59, %v235_v56  ;;  %v392_v62 = vpop.f32.mrb[2].mxu0 }
 0x18f   :  { %v316_v63 = vsel %vm64_vm0, %v315_v60, 0.0  ;;  %v393_v0 = vadd.f32 %v1439_v50, %v392_v62  ;;  %v1043_v1 = vpop.f32.mrb[3].mxu0 }
 0x190   :  { %v238_v2 = vrot.slane %v237_v61, 2  ;;  %v317_v3 = vrot.slane %v316_v63, 4 }
 0x191   :  { %v396_v4 = vmax.f32 %v393_v0, 0.0 }
 0x192   :  { %v239_v5 = vadd.f32 %v238_v2, %v237_v61  ;;  %v318_v6 = vadd.f32 %v317_v3, %v316_v63  ;;  %v473_v7 = vpop.f32.mrb[2].mxu1 }
 0x193   :  { %v397_v8 = vsel %vm64_vm0, %v396_v4, 0.0  ;;  %v474_v9 = vadd.f32 %v1439_v50, %v473_v7  ;;  %v1054_v10 = vpop.f32.mrb[3].mxu1 }
 0x194   :  { %v319_v11 = vrot.slane %v318_v6, 2  ;;  %v398_v12 = vrot.slane %v397_v8, 4  ;;  %v240_v14 = vrot.slane %v239_v5, 1 }
 0x195   :  { %v477_v13 = vmax.f32 %v474_v9, 0.0 }
 0x196   :  { %v320_v15 = vadd.f32 %v319_v11, %v318_v6  ;;  %v399_v16 = vadd.f32 %v398_v12, %v397_v8  ;;  %v554_v17 = vpop.f32.mrb[4].mxu0  ;;  %v241_v25 = vadd.f32 %v240_v14, %v239_v5 }
 0x197   :  { %v478_v18 = vsel %vm64_vm0, %v477_v13, 0.0  ;;  %v555_v19 = vadd.f32 %v1439_v50, %v554_v17  ;;  %v1065_v20 = vpop.f32.mrb[5].mxu0 }
 0x198   :  { %v321_v21 = vrot.slane %v320_v15, 1  ;;  %v400_v22 = vrot.slane %v399_v16, 2  ;;  %v479_v23 = vrot.slane %v478_v18, 4 }
 0x199   :  { %v558_v24 = vmax.f32 %v555_v19, 0.0 }
 0x19a   :  { %v322_v26 = vadd.f32 %v321_v21, %v320_v15  ;;  %v401_v28 = vadd.f32 %v400_v22, %v399_v16  ;;  %v480_v29 = vadd.f32 %v479_v23, %v478_v18  ;;  %v635_v30 = vpop.f32.mrb[4].mxu1  ;;  %v809_v18 = vld [vmem:[#allocation2] sm:$0xff] }
 0x19b   :  { %v559_v31 = vsel %vm64_vm0, %v558_v24, 0.0  ;;  %v636_v32 = vadd.f32 %v1439_v50, %v635_v30  ;;  %v1076_v33 = vpop.f32.mrb[5].mxu1  ;;  %v964_v23 = vld [vmem:[%s1479_s4] ss:$0 sm:$0xff]  ;;  %s1279_s4 = smov [#allocation9]  }
 0x19c   :  { %v811_v34 = vsel %vm810_vm10, %v241_v25, %v322_v26  ;;  %v402_v35 = vrot.slane %v401_v28, 1  ;;  %v481_v36 = vrot.slane %v480_v29, 2  ;;  %v560_v37 = vrot.slane %v559_v31, 4  ;;  %s937_s6 = sshll.u32 %s1279_s4, 4  ;;  %s938_s6 = int_to_ptr.vmem [resolvable:$true] %s937_s6 }
 0x19d   :  { %v639_v38 = vmax.f32 %v636_v32, 0.0  ;;  %s1243_s7 = scalar_lea.vmem %s938_s6, 128  ;;  %p1248_p11 = scmp.lt.s32.totalorder %s938_s6, %s938_s6 }
 0x19e   :  { %v403_v39 = vadd.f32 %v402_v35, %v401_v28  ;;  %v482_v40 = vadd.f32 %v481_v36, %v480_v29  ;;  %v561_v41 = vadd.f32 %v560_v37, %v559_v31  ;;  %v716_v42 = vpop.f32.mrb[6].mxu0  ;;  %p1244_p10 = scmp.ne.s32.totalorder %s938_s6, %s1243_s7  ;;  %p1249_p12 = scmp.lt.s32.totalorder %s1243_s7, %s1243_s7 }
 0x19f   :  { %v640_v43 = vsel %vm64_vm0, %v639_v38, 0.0  ;;  %v717_v44 = vadd.f32 %v1439_v50, %v716_v42  ;;  %v1087_v45 = vpop.f32.mrb[7].mxu0 }
 0x1a0   :  { %v813_v46 = vsel %vm812_vm11, %v811_v34, %v403_v39  ;;  %v483_v47 = vrot.slane %v482_v40, 1  ;;  %v562_v48 = vrot.slane %v561_v41, 2  ;;  %v641_v49 = vrot.slane %v640_v43, 4  ;;  %p1250_p13 = por %p1249_p12, %p1248_p11 }
 0x1a1   :  { %v720_v51 = vmax.f32 %v717_v44, 0.0 }
 0x1a2   :  { %v484_v52 = vadd.f32 %v483_v47, %v482_v40  ;;  %v563_v53 = vadd.f32 %v562_v48, %v561_v41  ;;  %v642_v54 = vadd.f32 %v641_v49, %v640_v43  ;;  %v797_v55 = vpop.f32.mrb[6].mxu1  ;;  %p1251_p0 = pnand %p1250_p13, %p1244_p10 }
 0x1a3   :  { %v721_v56 = vsel %vm64_vm0, %v720_v51, 0.0  ;;  %v798_v57 = vadd.f32 %v1439_v50, %v797_v55  ;;  %v1098_v58 = vpop.f32.mrb[7].mxu1 }
 0x1a4   :  { %v815_v59 = vsel %vm814_vm12, %v813_v46, %v484_v52  ;;  %v564_v60 = vrot.slane %v563_v53, 1  ;;  %v643_v61 = vrot.slane %v642_v54, 2  ;;  %v722_v62 = vrot.slane %v721_v56, 4 }
 0x1a5   :  { %v801_v63 = vmax.f32 %v798_v57, 0.0 }
 0x1a6   :  { %v565_v0 = vadd.f32 %v564_v60, %v563_v53  ;;  %v644_v1 = vadd.f32 %v643_v61, %v642_v54  ;;  %v723_v2 = vadd.f32 %v722_v62, %v721_v56 }
 0x1a7   :  { %v802_v3 = vsel %vm64_vm0, %v801_v63, 0.0 }
 0x1a8   :  { %v817_v4 = vsel %vm816_vm13, %v815_v59, %v565_v0  ;;  %v645_v5 = vrot.slane %v644_v1, 1  ;;  %v724_v6 = vrot.slane %v723_v2, 2  ;;  %v803_v7 = vrot.slane %v802_v3, 4 }
 0x1aa   :  { %v646_v8 = vadd.f32 %v645_v5, %v644_v1  ;;  %v725_v9 = vadd.f32 %v724_v6, %v723_v2  ;;  %v804_v50 = vadd.f32 %v803_v7, %v802_v3 }
 0x1ac   :  { %v819_v10 = vsel %vm818_vm14, %v817_v4, %v646_v8  ;;  %v726_v11 = vrot.slane %v725_v9, 1  ;;  %v805_v12 = vrot.slane %v804_v50, 2 }
 0x1ae   :  { %v727_v13 = vadd.f32 %v726_v11, %v725_v9  ;;  %v806_v14 = vadd.f32 %v805_v12, %v804_v50 }
 0x1b0   :  { %v821_v15 = vsel %vm820_vm15, %v819_v10, %v727_v13  ;;  %v807_v16 = vrot.slane %v806_v14, 1 }
 0x1b2   :  { %v808_v17 = vadd.f32 %v807_v16, %v806_v14 }
 0x1b4   :  { %v823_v19 = vsel %vm822_vm1, %v821_v15, %v808_v17 }
 0x1b5   :  { %v824_v20 = vadd.f32 %v823_v19, %v809_v18 }
 0x1b7   :  { %825 = vst.msk [vmem:[#allocation2] sm:$0xff] %vm64_vm0, %v824_v20 }
 0x1be   :  { %v829_v21 = vld [vmem:[#allocation2] sm:$0xff] }
 0x1bf   :  { %v830_v22 = vmul.f32 0.125, %v829_v21 }
 0x1c1   :  { %1108 = vmatmul.mubr.msk.f32.vlgmr.msra.gmra.mrb[8].mxu0 %vm64_vm0, %v830_v22 }
 0x294   :  { %v911_v24 = vpop.f32.mrb[8].mxu0 }
 0x295   :  { %v912_v25 = vadd.f32 %v964_v23, %v911_v24  ;;  %v1109_v26 = vpop.f32.mrb[9].mxu0 }
 0x297   :  { %v916_v28 = vsel %vm915_vm2, %v912_v25, -1e+30 }
 0x298   :  { %917 = vmax.xlane.f32.xlu0 %v916_v28 }
 0x325   :  { %v918_v29 = vpop.xlane.xlu0 %917 }
 0x326   :  { %v919_v30 = vsub.f32 %v916_v28, %v918_v29 }
 0x328   :  { %v920_v31 = vmul.f32 1.442695, %v919_v30 }
 0x32a   :  { %1173 = vpow2.f32 %v920_v31 }
 0x334   :  { %v1174_v32 = vpop.eup %1173 }
 0x335   :  { %v922_v33 = vsel %vm915_vm2, %v1174_v32, 0.0 }
 0x336   :  { %923 = vadd.xlane.f32.xlu1 %v922_v33 }
 0x3c3   :  { %v924_v34 = vpop.xlane.xlu1 %923 }
 0x3c4   :  { %1175 = vrcp.f32 %v924_v34 }
 0x3ce   :  { %v1176_v35 = vpop.eup %1175 }
 0x3cf   :  { %v926_v36 = vmul.f32 %v1176_v35, %v924_v34 }
 0x3d1   :  { %v927_v37 = vsub.f32 2.0, %v926_v36 }
 0x3d3   :  { %v928_v38 = vmul.f32 %v1176_v35, %v927_v37 }
 0x3d5   :  { %v929_v27 = vmul.f32 %v928_v38, %v922_v33 }
 0x3d7   :  { %930 = vst [vmem:[#allocation9] sm:$0xff] %v929_v27 }
 0x3d8   :  { %1254 = shalt.err (!%p1251_p0)
}
 0x3d9   :  { %s1255_s10 = scalar_lea.hbm %s1480_s5, 128 }
 0x3da   :  { %p1256_p1 = scmp.ne.s32.totalorder %s1480_s5, %s1255_s10  ;;  %p1259_p2 = scmp.lt.u32.totalorder %s1255_s10, %s1480_s5 }
 0x3dc   :  { %p1261_p3 = pnand %p1259_p2, %p1256_p1 }
 0x3de   :  { %1264 = shalt.err (!%p1261_p3)
}
 0x3df   :  { %940 = dma.vmem_to_hbm [thread:$0]  %s938_s6, 128, %s1480_s5, [#allocation5]  }
 0x3e0   :  { %1269 = dma.done.wait [#allocation5], 128  }
 0x3e1   :  { %1270 = vsyncadd [#allocation5], 4294967168 }
 0x3e2   :  { %944 = vsyncpa [#allocation4], 1 }
 0x3e3   :  { %945 = vsyncpa [#allocation7], 1 }
 0x3e4   :  { %946 = vsyncpa [#allocation5], 1 }

</bundles_post_ra>
